<compile_context>
chip_gen: v7x
topology: tpu7x:2x2x1
jax: 0.10.0
libtpu: 0.0.40
codegen_flags: <defaults>
</compile_context>

<pallas_src>
import functools
import math

import jax
import jax.numpy as jnp
from jax import lax
from jax.experimental import pallas as pl
from jax.experimental.pallas import tpu as pltpu


def next_power_of_2_python(n):
    return 2 ** math.ceil(math.log2(n))


def _round_up(x, m):
    return -(-x // m) * m


def _int_power(x, p):
    """x**p for integer p >= 1 using a squaring chain (trace-time unrolled)."""
    assert p >= 1
    result = None
    base = x
    while p > 0:
        if p & 1:
            result = base if result is None else result * base
        p >>= 1
        if p:
            base = base * base
    return result


def _vmem_limit_bytes():
    """~3/4 of physical VMEM: ~96 MiB on v5e/v6e (128 MiB), ~48 MiB on v7x (64 MiB)."""
    try:
        info = pltpu.get_tpu_info()
        for name in ("vmem_capacity_bytes", "vmem_size_bytes", "vmem_bytes"):
            cap = getattr(info, name, None)
            if cap:
                return min(int(cap) * 3 // 4, 96 * 1024 * 1024)
    except Exception:
        pass
    return 48 * 1024 * 1024


# ------------------------------ Pallas kernel ------------------------------ #

def _poly_attn_kernel(i_tab_ref, j_tab_ref, q_ref, k_ref, v_ref, o_ref,
                      *scratch, blk_q, blk_kv, poly_order, num_heads,
                      head_dim, fuse_den):
    """Grid = (B, num_tri_steps).  Step t of batch b handles q block i_tab[t]
    against kv block j_tab[t] (only blocks intersecting the causal triangle
    appear in the schedule, so there are no dead steps).

    q_ref:             (H, blk_q,  Dh)  bf16 (1/sqrt(Dh) already folded in).
    k_ref:             (H, blk_kv, Dh)  bf16.
    v_ref:             (H, blk_kv, Dv)  bf16, Dv = Dh (+1 ones column if fused den).
    o_ref:             (blk_q, H, Dh)   written once per q block at the last kv step.
    scratch[0] acc:    (H, blk_q, Dv)   f32, resident across kv steps.
    scratch[1] den:    (H, blk_q)       f32, only when the denominator is not fused.
    """
    acc_ref = scratch[0]
    den_ref = None if fuse_den else scratch[1]
    r = blk_q // blk_kv               # kv blocks per q block row
    t = pl.program_id(1)
    i = i_tab_ref[t]                  # q block index
    j = j_tab_ref[t]                  # kv block index (0 .. (i+1)*r - 1)

    @pl.when(j == 0)
    def _init():
        acc_ref[...] = jnp.zeros_like(acc_ref)
        if den_ref is not None:
            den_ref[...] = jnp.zeros_like(den_ref)

    def _make_accumulate(apply_mask):
        def _accumulate():
            q = q_ref[...]            # (H, blk_q,  Dh) bf16
            k = k_ref[...]            # (H, blk_kv, Dh) bf16
            v = v_ref[...]            # (H, blk_kv, Dv) bf16

            # Batched-over-heads q @ k^T on the MXU, f32 accumulation,
            # contracting over Dh directly (no explicit transpose of k).
            # NOTE: bf16 inputs then ^p amplifies rounding; acceptable vs MXU
            # throughput, keep in mind for strict fp32 parity checks.
            s = lax.dot_general(
                q, k,
                dimension_numbers=(((2,), (2,)), ((0,), (0,))),
                preferred_element_type=jnp.float32)          # (H, blk_q, blk_kv)

            # polynomial kernel: s**p via squaring (p=4 -> 2 multiplies).
            a = _int_power(s, poly_order)

            if apply_mask:
                # Causal mask from global positions; only executed on blocks
                # that straddle the diagonal.
                row = i * blk_q + lax.broadcasted_iota(
                    jnp.int32, (blk_q, blk_kv), 0)
                col = j * blk_kv + lax.broadcasted_iota(
                    jnp.int32, (blk_q, blk_kv), 1)
                a = jnp.where((row >= col)[None, :, :], a, 0.0)

            a_b = a.astype(v.dtype)
            # PV matmul; when fuse_den, V carries a ones column so the row-sum
            # denominator is produced as the extra output column for free.
            acc_ref[...] += lax.dot_general(
                a_b, v,
                dimension_numbers=(((2,), (1,)), ((0,), (0,))),
                preferred_element_type=jnp.float32)           # (H, blk_q, Dv)
            if den_ref is not None:
                den_ref[...] += jnp.sum(a_b.astype(jnp.float32), axis=-1)
        return _accumulate

    # Blocks j >= i*r straddle the diagonal and need the mask; earlier blocks
    # are entirely below it.
    needs_mask = j >= i * r
    pl.when(needs_mask)(_make_accumulate(True))
    pl.when(jnp.logical_not(needs_mask))(_make_accumulate(False))

    @pl.when(j == (i + 1) * r - 1)
    def _finalize():
        acc = acc_ref[...]
        if fuse_den:
            num = acc[..., :head_dim]                 # (H, blk_q, Dh)
            den = acc[..., head_dim:head_dim + 1]     # (H, blk_q, 1)
        else:
            num = acc
            den = den_ref[...][..., None]             # (H, blk_q, 1)
        # Exact division (matches a reference that divides exactly); runs once
        # per q block so it is off the critical path.
        for h in range(num_heads):
            # Each per-head store targets a full, tile-aligned (blk_q, Dh)
            # slab of the (blk_q, H, Dh) output block (no masked partial vst);
            # the HBM layout is already '... n (h d)'.
            o_ref[:, h, :] = (num[h] / den[h]).astype(o_ref.dtype)


def poly_attention_pallas(q, k, v, *, poly_order, block_size_q=512,
                          block_size_kv=256, out_dtype=jnp.bfloat16):
    """q, k, v: (B, H, N, Dh).  Any 1/sqrt(Dh) scaling must already be folded
    into q.  Returns (B, N, H*Dh) causal polynomial attention output."""
    B, H, N, Dh = q.shape
    assert block_size_q % block_size_kv == 0

    q = q.astype(jnp.bfloat16)
    k = k.astype(jnp.bfloat16)
    v = v.astype(jnp.bfloat16)

    # Decoupled block sizes: blk_kv | blk_q | n_pad.
    if N <= block_size_kv:
        blk_kv = blk_q = max(8, _round_up(N, 8))
    else:
        blk_kv = block_size_kv
        blk_q = min(block_size_q, _round_up(N, blk_kv))
    n_pad = _round_up(N, blk_q)
    # TODO(synk): handle the ragged sequence tail in-kernel (mask positions
    # >= N via the existing iota path) instead of padding in HBM.
    if n_pad != N:
        pad = ((0, 0), (0, 0), (0, n_pad - N), (0, 0))
        # Zero-padded kv rows contribute exactly 0 to numerator & denominator.
        q = jnp.pad(q, pad)
        k = jnp.pad(k, pad)
        v = jnp.pad(v, pad)
    nb_q = n_pad // blk_q
    r = blk_q // blk_kv

    # Fuse the denominator into the PV matmul when head_dim < 128: the ones
    # column lives inside V's already lane-padded 128-lane slab, removing an
    # XLU cross-lane reduction per step and guaranteeing that numerator and
    # denominator use identical bf16 weights.  For head_dim >= 128 the extra
    # column would force an extra MXU output pass, so keep the separate sum.
    fuse_den = Dh < 128
    if fuse_den:
        v = jnp.pad(v, ((0, 0), (0, 0), (0, 0), (0, 1)), constant_values=1.0)
    v_dim = v.shape[-1]

    # Flattened triangular schedule: only (i, j) pairs intersecting the causal
    # triangle, so no dead grid steps.
    i_list, j_list = [], []
    for i in range(nb_q):
        for j in range((i + 1) * r):
            i_list.append(i)
            j_list.append(j)
    i_tab = jnp.asarray(i_list, dtype=jnp.int32)
    j_tab = jnp.asarray(j_list, dtype=jnp.int32)
    num_steps = len(i_list)

    kernel = functools.partial(
        _poly_attn_kernel, blk_q=blk_q, blk_kv=blk_kv, poly_order=poly_order,
        num_heads=H, head_dim=Dh, fuse_den=fuse_den)

    def q_map(b, t, it, jt):
        return (b, 0, it[t], 0)

    def kv_map(b, t, it, jt):
        return (b, 0, jt[t], 0)

    def o_map(b, t, it, jt):
        return (b, it[t], 0, 0)

    scratch = [pltpu.VMEM((H, blk_q, v_dim), jnp.float32)]     # acc (+den col)
    if not fuse_den:
        scratch.append(pltpu.VMEM((H, blk_q), jnp.float32))    # compact den

    # NOTE: with small head_dim (< 128) the MXU is underutilized and the score
    # path (VPU) dominates; head_dim a multiple of 128 is preferred model-side.
    flops = 4 * B * num_steps * H * blk_q * blk_kv * Dh
    bytes_accessed = (B * H * n_pad * Dh * 2                       # q (read once)
                      + B * num_steps * H * blk_kv * (Dh + v_dim) * 2  # k, v
                      + B * n_pad * H * Dh * 2)                    # output

    out = pl.pallas_call(
        kernel,
        out_shape=jax.ShapeDtypeStruct((B, n_pad, H, Dh), out_dtype),
        grid_spec=pltpu.PrefetchScalarGridSpec(
            num_scalar_prefetch=2,
            grid=(B, num_steps),
            in_specs=[
                pl.BlockSpec((pl.Squeezed(), H, blk_q, Dh), q_map),
                pl.BlockSpec((pl.Squeezed(), H, blk_kv, Dh), kv_map),
                pl.BlockSpec((pl.Squeezed(), H, blk_kv, v_dim), kv_map),
            ],
            out_specs=pl.BlockSpec((pl.Squeezed(), blk_q, H, Dh), o_map),
            scratch_shapes=scratch,
        ),
        compiler_params=pltpu.CompilerParams(
            dimension_semantics=("parallel", "arbitrary"),
            vmem_limit_bytes=_vmem_limit_bytes(),
        ),
        cost_estimate=pl.CostEstimate(
            flops=flops,
            transcendentals=B * H * n_pad,
            bytes_accessed=bytes_accessed),
    )(i_tab, j_tab, q, k, v)

    # (B, n_pad, H, Dh) -> (B, N, H*Dh); the reshape is a free metadata op
    # because heads are already contiguous per token in HBM.
    return out[:, :N].reshape(B, N, H * Dh)


# ------------------------------ JAX glue ----------------------------------- #

def lrpe_rotate(x, *, base=10000, offset=0):
    """Rotary positional embedding (lrpe_type=1), half-split convention.
    x: (B, N, H, Dh).  TODO(synk): verify against the exact xmixers Lrpe."""
    b, n, h, d = x.shape
    half = d // 2
    theta = base ** (-2.0 * jnp.arange(half, dtype=jnp.float32) / d)   # (d/2,)
    pos = jnp.arange(offset, offset + n, dtype=jnp.float32)            # (n,)
    angle = pos[:, None] * theta[None, :]                              # (n, d/2)
    cos = jnp.cos(angle)[None, :, None, :]
    sin = jnp.sin(angle)[None, :, None, :]
    xf = x.astype(jnp.float32)
    x1, x2 = xf[..., :half], xf[..., half:]
    out = jnp.concatenate([x1 * cos - x2 * sin, x2 * cos + x1 * sin], axis=-1)
    return out.astype(x.dtype)


def init_poly_attention_params(key, embed_dim, *, init_std=0.02):
    """Deterministic synthetic init of q/k/v/o projection weights (no bias).

    nn.Linear stores weight as (out_features, in_features); forward is x @ W.T.
    """
    ks = jax.random.split(key, 4)
    shape = (embed_dim, embed_dim)  # kv_heads == -1 -> kv_dim == embed_dim
    return {
        "q_proj": init_std * jax.random.normal(ks[0], shape, jnp.float32),
        "k_proj": init_std * jax.random.normal(ks[1], shape, jnp.float32),
        "v_proj": init_std * jax.random.normal(ks[2], shape, jnp.float32),
        "o_proj": init_std * jax.random.normal(ks[3], shape, jnp.float32),
    }


def poly_attention_forward(
    params,
    x,
    *,
    num_heads,
    poly_order=4,
    use_lrpe=True,
    base=10000,
    block_size_q=512,
    block_size_kv=256,
):
    """Mirrors PolyAttention.forward (no past_key_values, no attention_mask,
    window_size=-1 so no sliding-window branch; causal=True)."""
    b, n, d = x.shape
    head_dim = d // num_heads
    scale = float(head_dim) ** -0.5

    # 1/sqrt(Dh) folded into the q projection (it cancels in the normalization
    # but is kept for overflow control of s**p).
    q = x @ (params["q_proj"].T * scale)
    k = x @ params["k_proj"].T
    v = x @ params["v_proj"].T

    # '... n (h d) -> ... n h d'
    q = q.reshape(b, n, num_heads, head_dim)
    k = k.reshape(b, n, num_heads, head_dim)
    v = v.reshape(b, n, num_heads, head_dim)

    if use_lrpe:
        q = lrpe_rotate(q, base=base, offset=0)
        k = lrpe_rotate(k, base=base, offset=0)

    # (B, H, N, Dh), bf16 into the kernel (halves the pre-kernel HBM bytes).
    qh = jnp.transpose(q, (0, 2, 1, 3)).astype(jnp.bfloat16)
    kh = jnp.transpose(k, (0, 2, 1, 3)).astype(jnp.bfloat16)
    vh = jnp.transpose(v, (0, 2, 1, 3)).astype(jnp.bfloat16)

    # kernel output is already '... n (h d)', bf16.
    out = poly_attention_pallas(
        qh, kh, vh, poly_order=poly_order,
        block_size_q=block_size_q, block_size_kv=block_size_kv,
        out_dtype=jnp.bfloat16)
    out = jnp.dot(out, params["o_proj"].T, preferred_element_type=jnp.float32)
    return out.astype(x.dtype)


# ------------------------------ main --------------------------------------- #

if __name__ == "__main__":
    # small shapes consistent with the module
    batch, seq_len = 2, 16
    embed_dim, num_heads = 64, 4          # head_dim = 16

    key = jax.random.PRNGKey(0)
    k_params, k_x = jax.random.split(key)

    params = init_poly_attention_params(k_params, embed_dim, init_std=0.02)
    x = jax.random.normal(k_x, (batch, seq_len, embed_dim), jnp.float32)

    fwd = jax.jit(functools.partial(
        poly_attention_forward, num_heads=num_heads, poly_order=4,
        use_lrpe=True, base=10000))
    out = fwd(params, x)
    jax.block_until_ready(out)
    assert out.shape == (batch, seq_len, embed_dim)
    assert bool(jnp.all(jnp.isfinite(out)))
    print("KERNEL_OK")
</pallas_src>

<mosaic_0001>
module attributes {stable_mosaic.version = 11 : i64} {
  func.func @_poly_attn_kernel(%arg0: i32, %arg1: i32, %arg2: memref<1xi32, #tpu.memory_space<smem>>, %arg3: memref<1xi32, #tpu.memory_space<smem>>, %arg4: memref<1x4x16x16xbf16, #tpu.memory_space<vmem>>, %arg5: memref<1x4x16x16xbf16, #tpu.memory_space<vmem>>, %arg6: memref<1x4x16x17xbf16, #tpu.memory_space<vmem>>, %arg7: memref<1x16x4x16xbf16, #tpu.memory_space<vmem>>, %arg8: memref<4x16x17xf32, #tpu.memory_space<vmem>>) attributes {dimension_semantics = [#tpu.dimension_semantics<parallel>, #tpu.dimension_semantics<arbitrary>], iteration_bounds = array<i64: 2, 1>, scalar_prefetch = 2 : i64, scratch_operands = 1 : i64, tpu.core_type = #tpu.core_type<tc>, window_params = [{transform_indices = @transform_0, window_bounds = array<i64: 1, 4, 16, 16>}, {transform_indices = @transform_1, window_bounds = array<i64: 1, 4, 16, 16>}, {transform_indices = @transform_2, window_bounds = array<i64: 1, 4, 16, 17>}, {transform_indices = @transform_3, window_bounds = array<i64: 1, 16, 4, 16>}]} {
    %0 = arith.index_cast %arg1 : i32 to index
    %1 = memref.load %arg2[%0] : memref<1xi32, #tpu.memory_space<smem>>
    %2 = arith.index_cast %arg1 : i32 to index
    %3 = memref.load %arg3[%2] : memref<1xi32, #tpu.memory_space<smem>>
    %c0_i32 = arith.constant 0 : i32
    %4 = arith.cmpi eq, %3, %c0_i32 : i32
    %5 = arith.extui %4 : i1 to i32
    %c0_i32_0 = arith.constant 0 : i32
    %6 = arith.cmpi ne, %5, %c0_i32_0 : i32
    scf.if %6 {
      %cst = arith.constant 0.000000e+00 : f32
      %20 = vector.broadcast %cst : f32 to vector<4x16x17xf32>
      %c0 = arith.constant 0 : index
      %c0_7 = arith.constant 0 : index
      %c0_8 = arith.constant 0 : index
      %21 = vector.load %arg8[%c0, %c0_7, %c0_8] : memref<4x16x17xf32, #tpu.memory_space<vmem>>, vector<4x16x17xf32>
      tpu.vector_store %arg8[%c0, %c0_7, %c0_8], %20 {strides = array<i32>} : memref<4x16x17xf32, #tpu.memory_space<vmem>>, vector<4x16x17xf32>,
    } else {
    }
    %c1_i32 = arith.constant 1 : i32
    %7 = arith.muli %1, %c1_i32 : i32
    %8 = arith.cmpi sge, %3, %7 : i32
    %9 = arith.extui %8 : i1 to i32
    %c0_i32_1 = arith.constant 0 : i32
    %10 = arith.cmpi ne, %9, %c0_i32_1 : i32
    scf.if %10 {
      %c0 = arith.constant 0 : index
      %c0_7 = arith.constant 0 : index
      %c0_8 = arith.constant 0 : index
      %c0_9 = arith.constant 0 : index
      %20 = vector.load %arg4[%c0, %c0_7, %c0_8, %c0_9] : memref<1x4x16x16xbf16, #tpu.memory_space<vmem>>, vector<1x4x16x16xbf16>
      %21 = vector.shape_cast %20 : vector<1x4x16x16xbf16> to vector<4x16x16xbf16>
      %c0_10 = arith.constant 0 : index
      %c0_11 = arith.constant 0 : index
      %c0_12 = arith.constant 0 : index
      %c0_13 = arith.constant 0 : index
      %22 = vector.load %arg5[%c0_10, %c0_11, %c0_12, %c0_13] : memref<1x4x16x16xbf16, #tpu.memory_space<vmem>>, vector<1x4x16x16xbf16>
      %23 = vector.shape_cast %22 : vector<1x4x16x16xbf16> to vector<4x16x16xbf16>
      %c0_14 = arith.constant 0 : index
      %c0_15 = arith.constant 0 : index
      %c0_16 = arith.constant 0 : index
      %c0_17 = arith.constant 0 : index
      %24 = vector.load %arg6[%c0_14, %c0_15, %c0_16, %c0_17] : memref<1x4x16x17xbf16, #tpu.memory_space<vmem>>, vector<1x4x16x17xbf16>
      %25 = vector.shape_cast %24 : vector<1x4x16x17xbf16> to vector<4x16x17xbf16>
      %cst = arith.constant dense<0.000000e+00> : vector<4x16x16xf32>
      %26 = tpu.matmul %21, %23, %cst {dimension_numbers = #tpu.dot_dimension_numbers<[2], [2], [1], [1], [0, 0, 0, 1, 1, 1], [0], [0]>} : vector<4x16x16xbf16>, vector<4x16x16xbf16>, vector<4x16x16xf32> -> vector<4x16x16xf32>
      %27 = arith.mulf %26, %26 : vector<4x16x16xf32>
      %28 = arith.mulf %27, %27 : vector<4x16x16xf32>
      %c16_i32 = arith.constant 16 : i32
      %29 = arith.muli %1, %c16_i32 : i32
      %30 = tpu.iota {dimensions = array<i32: 0>} : vector<16x16xi32>
      %31 = vector.broadcast %29 : i32 to vector<16x16xi32>
      %32 = arith.addi %31, %30 : vector<16x16xi32>
      %c16_i32_18 = arith.constant 16 : i32
      %33 = arith.muli %3, %c16_i32_18 : i32
      %34 = tpu.iota {dimensions = array<i32: 1>} : vector<16x16xi32>
      %35 = vector.broadcast %33 : i32 to vector<16x16xi32>
      %36 = arith.addi %35, %34 : vector<16x16xi32>
      %37 = arith.cmpi sge, %32, %36 : vector<16x16xi32>
      %38 = vector.shape_cast %37 : vector<16x16xi1> to vector<1x16x16xi1>
      %cst_19 = arith.constant 0.000000e+00 : f32
      %39 = vector.shape_cast %38 : vector<1x16x16xi1> to vector<1x16x16xi1>
      %40 = vector.broadcast %39 : vector<1x16x16xi1> to vector<4x16x16xi1>
      %41 = vector.broadcast %cst_19 : f32 to vector<4x16x16xf32>
      %42 = arith.select %40, %28, %41 : vector<4x16x16xi1>, vector<4x16x16xf32>
      %43 = arith.truncf %42 : vector<4x16x16xf32> to vector<4x16x16xbf16>
      %c0_20 = arith.constant 0 : index
      %c0_21 = arith.constant 0 : index
      %c0_22 = arith.constant 0 : index
      %44 = vector.load %arg8[%c0_20, %c0_21, %c0_22] : memref<4x16x17xf32, #tpu.memory_space<vmem>>, vector<4x16x17xf32>
      %cst_23 = arith.constant dense<0.000000e+00> : vector<4x16x17xf32>
      %45 = tpu.matmul %43, %25, %cst_23 {dimension_numbers = #tpu.dot_dimension_numbers<[2], [1], [1], [2], [0, 0, 0, 1, 1, 2], [0], [0]>} : vector<4x16x16xbf16>, vector<4x16x17xbf16>, vector<4x16x17xf32> -> vector<4x16x17xf32>
      %46 = arith.addf %44, %45 : vector<4x16x17xf32>
      %c0_24 = arith.constant 0 : index
      %c0_25 = arith.constant 0 : index
      %c0_26 = arith.constant 0 : index
      %47 = vector.load %arg8[%c0_24, %c0_25, %c0_26] : memref<4x16x17xf32, #tpu.memory_space<vmem>>, vector<4x16x17xf32>
      tpu.vector_store %arg8[%c0_24, %c0_25, %c0_26], %46 {strides = array<i32>} : memref<4x16x17xf32, #tpu.memory_space<vmem>>, vector<4x16x17xf32>,
    } else {
    }
    %true = arith.constant true
    %11 = arith.xori %8, %true : i1
    %12 = arith.extui %11 : i1 to i32
    %c0_i32_2 = arith.constant 0 : i32
    %13 = arith.cmpi ne, %12, %c0_i32_2 : i32
    scf.if %13 {
      %c0 = arith.constant 0 : index
      %c0_7 = arith.constant 0 : index
      %c0_8 = arith.constant 0 : index
      %c0_9 = arith.constant 0 : index
      %20 = vector.load %arg4[%c0, %c0_7, %c0_8, %c0_9] : memref<1x4x16x16xbf16, #tpu.memory_space<vmem>>, vector<1x4x16x16xbf16>
      %21 = vector.shape_cast %20 : vector<1x4x16x16xbf16> to vector<4x16x16xbf16>
      %c0_10 = arith.constant 0 : index
      %c0_11 = arith.constant 0 : index
      %c0_12 = arith.constant 0 : index
      %c0_13 = arith.constant 0 : index
      %22 = vector.load %arg5[%c0_10, %c0_11, %c0_12, %c0_13] : memref<1x4x16x16xbf16, #tpu.memory_space<vmem>>, vector<1x4x16x16xbf16>
      %23 = vector.shape_cast %22 : vector<1x4x16x16xbf16> to vector<4x16x16xbf16>
      %c0_14 = arith.constant 0 : index
      %c0_15 = arith.constant 0 : index
      %c0_16 = arith.constant 0 : index
      %c0_17 = arith.constant 0 : index
      %24 = vector.load %arg6[%c0_14, %c0_15, %c0_16, %c0_17] : memref<1x4x16x17xbf16, #tpu.memory_space<vmem>>, vector<1x4x16x17xbf16>
      %25 = vector.shape_cast %24 : vector<1x4x16x17xbf16> to vector<4x16x17xbf16>
      %cst = arith.constant dense<0.000000e+00> : vector<4x16x16xf32>
      %26 = tpu.matmul %21, %23, %cst {dimension_numbers = #tpu.dot_dimension_numbers<[2], [2], [1], [1], [0, 0, 0, 1, 1, 1], [0], [0]>} : vector<4x16x16xbf16>, vector<4x16x16xbf16>, vector<4x16x16xf32> -> vector<4x16x16xf32>
      %27 = arith.mulf %26, %26 : vector<4x16x16xf32>
      %28 = arith.mulf %27, %27 : vector<4x16x16xf32>
      %29 = arith.truncf %28 : vector<4x16x16xf32> to vector<4x16x16xbf16>
      %c0_18 = arith.constant 0 : index
      %c0_19 = arith.constant 0 : index
      %c0_20 = arith.constant 0 : index
      %30 = vector.load %arg8[%c0_18, %c0_19, %c0_20] : memref<4x16x17xf32, #tpu.memory_space<vmem>>, vector<4x16x17xf32>
      %cst_21 = arith.constant dense<0.000000e+00> : vector<4x16x17xf32>
      %31 = tpu.matmul %29, %25, %cst_21 {dimension_numbers = #tpu.dot_dimension_numbers<[2], [1], [1], [2], [0, 0, 0, 1, 1, 2], [0], [0]>} : vector<4x16x16xbf16>, vector<4x16x17xbf16>, vector<4x16x17xf32> -> vector<4x16x17xf32>
      %32 = arith.addf %30, %31 : vector<4x16x17xf32>
      %c0_22 = arith.constant 0 : index
      %c0_23 = arith.constant 0 : index
      %c0_24 = arith.constant 0 : index
      %33 = vector.load %arg8[%c0_22, %c0_23, %c0_24] : memref<4x16x17xf32, #tpu.memory_space<vmem>>, vector<4x16x17xf32>
      tpu.vector_store %arg8[%c0_22, %c0_23, %c0_24], %32 {strides = array<i32>} : memref<4x16x17xf32, #tpu.memory_space<vmem>>, vector<4x16x17xf32>,
    } else {
    }
    %c1_i32_3 = arith.constant 1 : i32
    %14 = arith.addi %1, %c1_i32_3 : i32
    %c1_i32_4 = arith.constant 1 : i32
    %15 = arith.muli %14, %c1_i32_4 : i32
    %c1_i32_5 = arith.constant 1 : i32
    %16 = arith.subi %15, %c1_i32_5 : i32
    %17 = arith.cmpi eq, %3, %16 : i32
    %18 = arith.extui %17 : i1 to i32
    %c0_i32_6 = arith.constant 0 : i32
    %19 = arith.cmpi ne, %18, %c0_i32_6 : i32
    scf.if %19 {
      %c0 = arith.constant 0 : index
      %c0_7 = arith.constant 0 : index
      %c0_8 = arith.constant 0 : index
      %20 = vector.load %arg8[%c0, %c0_7, %c0_8] : memref<4x16x17xf32, #tpu.memory_space<vmem>>, vector<4x16x17xf32>
      %21 = vector.extract_strided_slice %20 {offsets = [0, 0, 0], sizes = [4, 16, 16], strides = [1, 1, 1]} : vector<4x16x17xf32> to vector<4x16x16xf32>
      %22 = vector.extract_strided_slice %20 {offsets = [0, 0, 16], sizes = [4, 16, 1], strides = [1, 1, 1]} : vector<4x16x17xf32> to vector<4x16x1xf32>
      %23 = vector.extract_strided_slice %21 {offsets = [0, 0, 0], sizes = [1, 16, 16], strides = [1, 1, 1]} : vector<4x16x16xf32> to vector<1x16x16xf32>
      %24 = vector.shape_cast %23 : vector<1x16x16xf32> to vector<16x16xf32>
      %25 = vector.extract_strided_slice %22 {offsets = [0, 0, 0], sizes = [1, 16, 1], strides = [1, 1, 1]} : vector<4x16x1xf32> to vector<1x16x1xf32>
      %26 = vector.shape_cast %25 : vector<1x16x1xf32> to vector<16x1xf32>
      %27 = vector.broadcast %26 : vector<16x1xf32> to vector<16x16xf32>
      %28 = arith.divf %24, %27 : vector<16x16xf32>
      %29 = arith.truncf %28 : vector<16x16xf32> to vector<16x16xbf16>
      %c0_9 = arith.constant 0 : index
      %c0_10 = arith.constant 0 : index
      %c0_11 = arith.constant 0 : index
      %c0_12 = arith.constant 0 : index
      %30 = vector.load %arg7[%c0_9, %c0_10, %c0_11, %c0_12] : memref<1x16x4x16xbf16, #tpu.memory_space<vmem>>, vector<1x16x1x16xbf16>
      %31 = vector.shape_cast %30 : vector<1x16x1x16xbf16> to vector<16x16xbf16>
      %32 = vector.shape_cast %29 : vector<16x16xbf16> to vector<1x16x1x16xbf16>
      tpu.vector_store %arg7[%c0_9, %c0_10, %c0_11, %c0_12], %32 {strides = array<i32>} : memref<1x16x4x16xbf16, #tpu.memory_space<vmem>>, vector<1x16x1x16xbf16>,
      %33 = vector.extract_strided_slice %21 {offsets = [1, 0, 0], sizes = [1, 16, 16], strides = [1, 1, 1]} : vector<4x16x16xf32> to vector<1x16x16xf32>
      %34 = vector.shape_cast %33 : vector<1x16x16xf32> to vector<16x16xf32>
      %35 = vector.extract_strided_slice %22 {offsets = [1, 0, 0], sizes = [1, 16, 1], strides = [1, 1, 1]} : vector<4x16x1xf32> to vector<1x16x1xf32>
      %36 = vector.shape_cast %35 : vector<1x16x1xf32> to vector<16x1xf32>
      %37 = vector.broadcast %36 : vector<16x1xf32> to vector<16x16xf32>
      %38 = arith.divf %34, %37 : vector<16x16xf32>
      %39 = arith.truncf %38 : vector<16x16xf32> to vector<16x16xbf16>
      %c0_13 = arith.constant 0 : index
      %c0_14 = arith.constant 0 : index
      %c1 = arith.constant 1 : index
      %c0_15 = arith.constant 0 : index
      %40 = vector.load %arg7[%c0_13, %c0_14, %c1, %c0_15] : memref<1x16x4x16xbf16, #tpu.memory_space<vmem>>, vector<1x16x1x16xbf16>
      %41 = vector.shape_cast %40 : vector<1x16x1x16xbf16> to vector<16x16xbf16>
      %42 = vector.shape_cast %39 : vector<16x16xbf16> to vector<1x16x1x16xbf16>
      tpu.vector_store %arg7[%c0_13, %c0_14, %c1, %c0_15], %42 {strides = array<i32>} : memref<1x16x4x16xbf16, #tpu.memory_space<vmem>>, vector<1x16x1x16xbf16>,
      %43 = vector.extract_strided_slice %21 {offsets = [2, 0, 0], sizes = [1, 16, 16], strides = [1, 1, 1]} : vector<4x16x16xf32> to vector<1x16x16xf32>
      %44 = vector.shape_cast %43 : vector<1x16x16xf32> to vector<16x16xf32>
      %45 = vector.extract_strided_slice %22 {offsets = [2, 0, 0], sizes = [1, 16, 1], strides = [1, 1, 1]} : vector<4x16x1xf32> to vector<1x16x1xf32>
      %46 = vector.shape_cast %45 : vector<1x16x1xf32> to vector<16x1xf32>
      %47 = vector.broadcast %46 : vector<16x1xf32> to vector<16x16xf32>
      %48 = arith.divf %44, %47 : vector<16x16xf32>
      %49 = arith.truncf %48 : vector<16x16xf32> to vector<16x16xbf16>
      %c0_16 = arith.constant 0 : index
      %c0_17 = arith.constant 0 : index
      %c2 = arith.constant 2 : index
      %c0_18 = arith.constant 0 : index
      %50 = vector.load %arg7[%c0_16, %c0_17, %c2, %c0_18] : memref<1x16x4x16xbf16, #tpu.memory_space<vmem>>, vector<1x16x1x16xbf16>
      %51 = vector.shape_cast %50 : vector<1x16x1x16xbf16> to vector<16x16xbf16>
      %52 = vector.shape_cast %49 : vector<16x16xbf16> to vector<1x16x1x16xbf16>
      tpu.vector_store %arg7[%c0_16, %c0_17, %c2, %c0_18], %52 {strides = array<i32>} : memref<1x16x4x16xbf16, #tpu.memory_space<vmem>>, vector<1x16x1x16xbf16>,
      %53 = vector.extract_strided_slice %21 {offsets = [3, 0, 0], sizes = [1, 16, 16], strides = [1, 1, 1]} : vector<4x16x16xf32> to vector<1x16x16xf32>
      %54 = vector.shape_cast %53 : vector<1x16x16xf32> to vector<16x16xf32>
      %55 = vector.extract_strided_slice %22 {offsets = [3, 0, 0], sizes = [1, 16, 1], strides = [1, 1, 1]} : vector<4x16x1xf32> to vector<1x16x1xf32>
      %56 = vector.shape_cast %55 : vector<1x16x1xf32> to vector<16x1xf32>
      %57 = vector.broadcast %56 : vector<16x1xf32> to vector<16x16xf32>
      %58 = arith.divf %54, %57 : vector<16x16xf32>
      %59 = arith.truncf %58 : vector<16x16xf32> to vector<16x16xbf16>
      %c0_19 = arith.constant 0 : index
      %c0_20 = arith.constant 0 : index
      %c3 = arith.constant 3 : index
      %c0_21 = arith.constant 0 : index
      %60 = vector.load %arg7[%c0_19, %c0_20, %c3, %c0_21] : memref<1x16x4x16xbf16, #tpu.memory_space<vmem>>, vector<1x16x1x16xbf16>
      %61 = vector.shape_cast %60 : vector<1x16x1x16xbf16> to vector<16x16xbf16>
      %62 = vector.shape_cast %59 : vector<16x16xbf16> to vector<1x16x1x16xbf16>
      tpu.vector_store %arg7[%c0_19, %c0_20, %c3, %c0_21], %62 {strides = array<i32>} : memref<1x16x4x16xbf16, #tpu.memory_space<vmem>>, vector<1x16x1x16xbf16>,
    } else {
    }
    return
  }
  func.func @transform_0(%arg0: i32, %arg1: i32, %arg2: memref<1xi32, #tpu.memory_space<smem>>, %arg3: memref<1xi32, #tpu.memory_space<smem>>) -> (i32, i32, i32, i32) {
    %0 = arith.index_cast %arg1 : i32 to index
    %1 = memref.load %arg2[%0] : memref<1xi32, #tpu.memory_space<smem>>
    %c0_i32 = arith.constant 0 : i32
    %c0_i32_0 = arith.constant 0 : i32
    %c0_i32_1 = arith.constant 0 : i32
    return %arg0, %c0_i32, %1, %c0_i32_0 : i32, i32, i32, i32
  }
  func.func @transform_1(%arg0: i32, %arg1: i32, %arg2: memref<1xi32, #tpu.memory_space<smem>>, %arg3: memref<1xi32, #tpu.memory_space<smem>>) -> (i32, i32, i32, i32) {
    %0 = arith.index_cast %arg1 : i32 to index
    %1 = memref.load %arg3[%0] : memref<1xi32, #tpu.memory_space<smem>>
    %c0_i32 = arith.constant 0 : i32
    %c0_i32_0 = arith.constant 0 : i32
    %c0_i32_1 = arith.constant 0 : i32
    return %arg0, %c0_i32, %1, %c0_i32_0 : i32, i32, i32, i32
  }
  func.func @transform_2(%arg0: i32, %arg1: i32, %arg2: memref<1xi32, #tpu.memory_space<smem>>, %arg3: memref<1xi32, #tpu.memory_space<smem>>) -> (i32, i32, i32, i32) {
    %0 = arith.index_cast %arg1 : i32 to index
    %1 = memref.load %arg3[%0] : memref<1xi32, #tpu.memory_space<smem>>
    %c0_i32 = arith.constant 0 : i32
    %c0_i32_0 = arith.constant 0 : i32
    %c0_i32_1 = arith.constant 0 : i32
    return %arg0, %c0_i32, %1, %c0_i32_0 : i32, i32, i32, i32
  }
  func.func @transform_3(%arg0: i32, %arg1: i32, %arg2: memref<1xi32, #tpu.memory_space<smem>>, %arg3: memref<1xi32, #tpu.memory_space<smem>>) -> (i32, i32, i32, i32) {
    %0 = arith.index_cast %arg1 : i32 to index
    %1 = memref.load %arg2[%0] : memref<1xi32, #tpu.memory_space<smem>>
    %c0_i32 = arith.constant 0 : i32
    %c0_i32_0 = arith.constant 0 : i32
    %c0_i32_1 = arith.constant 0 : i32
    return %arg0, %1, %c0_i32, %c0_i32_0 : i32, i32, i32, i32
  }
}

</mosaic_0001>

<bundles_post_ra>
// kernel: poly_attention_forward.1
= control target key start
LH: loop header
LB: loop body
LE: loop exit
PB: predicated region body
PF: predicated region fallthrough
CT: control target
= control target key end

     0   :  { %s2969_s22 = smov 0   ;;  %s2971_s23 = smov 0   ;;  %s3635_s0 = inlined_call_operand.<no memory space> [shape: s32[1], index: 0, kind: input, shape index: {}, may-alias: {0,1}]   ;;  %s3636_s1 = inlined_call_operand.<no memory space> [shape: s32[1], index: 1, kind: input, shape index: {}, may-alias: {0,1}]   ;;  %s3637_s2 = inlined_call_operand.vmem [shape: bf16[2,4,16,16], index: 2, kind: input, shape index: {}]   ;;  %s3638_s3 = inlined_call_operand.vmem [shape: bf16[2,4,16,16], index: 3, kind: input, shape index: {}]   ;;  %s3639_s4 = inlined_call_operand.vmem [shape: bf16[2,4,16,17], index: 4, kind: input, shape index: {}]   ;;  %s3640_s5 = inlined_call_operand.vmem [shape: bf16[2,16,4,16], index: 5, kind: output, shape index: {}]  }
   0x1   :  { %10 = sst [smem:[#allocation4]] %s3635_s0  ;;  %s2973_s24 = smov 0  }
   0x2   :  { %11 = sst [smem:[#allocation5]] %s3636_s1 }
   0x3 LB: > { %s29_s0 = sadd.s32 1, %s2919_s23  ;;  %p2602_p0 = scmp.ge.s32.totalorder %s2923_s24, 1  ;;  %s2923_s24 = sphi %s2973_s24, %s17_s24   ;;  %s2919_s23 = sphi %s2971_s23, %s3650_s23   ;;  %s2915_s22 = sphi %s2969_s22, %s3649_s22  }
   0x4   : > { %p31_p1 = scmp.ge.s32.totalorder %s29_s0, 2  ;;  %p210_p2 = scmp.lt.s32.totalorder %s2923_s24, 3 }
   0x6   : > { %s3652_s0 = smov (%p31_p1, %s29_s0), 0  ;;  %p211_p3 = pnand %p2602_p0, %p210_p2 }
   0x7   : > { %s2987_s1 = sld [smem:[#allocation4]] (!%p211_p3)  ;;  %p266_p4 = scmp.lt.s32.totalorder (!%p211_p3), %s2915_s22, 1 }
   0x8   : > { %214 = sbr.rel (%p211_p3) target bundleno = 1176 (0x498), region = 32  ;;  %s2989_s25 = sld [smem:[#allocation5]] (!%p211_p3) }
   0xd   : > { %s2603_s27 = sshll.u32 (!%p211_p3), %s2987_s1, 1  ;;  %s2994_s30 = sshll.u32 (!%p211_p3), %s2987_s1, 4 }
   0xe   : > { %p268_p5 = scmp.lt.s32.totalorder (!%p211_p3), %s2603_s27, 1  ;;  %s2606_s29 = sshll.u32 (!%p211_p3), %s2989_s25, 1 }
   0xf   : > { %s3654_s22 = smov (!%p266_p4, %s2915_s22), 1  ;;  %p280_p6 = scmp.lt.s32.totalorder %s2606_s29, 1 }
  0x10   : > { %s2604_s26 = sshll.u32 %s3654_s22, 3  ;;  %s2613_s28 = sshll.u32 %s3654_s22, 4 }
  0x11   : > { %s3656_s27 = smov (!%p268_p5, %s2603_s27), 1  ;;  %s3658_s29 = smov (!%p280_p6, %s2606_s29), 1 }
  0x12   : > { %s271_s6 = sadd.s32 %s2604_s26, %s3656_s27  ;;  %p304_p7 = scmp.lt.s32.totalorder %s2994_s30, 15 }
  0x13   : > { %s2605_s7 = sshll.u32 %s271_s6, 2  ;;  %s283_s8 = sadd.s32 %s2604_s26, %s3658_s29 }
  0x14   : > { %s3000_s11 = scalar_lea.vmem %s3637_s2, %s2605_s7  ;;  %s2608_s12 = sshll.u32 %s283_s8, 2 }
  0x15   : > { %s3005_s15 = scalar_lea.vmem %s3638_s3, %s2608_s12  ;;  %s3010_s18 = scalar_lea.vmem %s3639_s4, %s2608_s12 }
  0x16   : > { %s305_s19 = scalar_select %p304_p7, %s2994_s30, 15 }
  0x17   : > { %p2615_p8 = scmp.ne.s32.totalorder %s2989_s25, 0 }
  0x18   : > { %s307_s20 = sadd.s32 %s2613_s28, %s305_s19  ;;  %vm319_vm0 = vcmask (!%p2615_p8), 138240   ;;  %v2925_v0 = vmov (!%p2615_p8), 0.0  }
  0x19   : > { %s2614_s21 = sshll.u32 %s307_s20, 1  ;;  %318 = sbr.rel (%p2615_p8) target bundleno = 32 (0x20), region = 36  ;;  %320 = vst.msk [vmem:[#allocation2] sm:$0xff] (!%p2615_p8), %vm319_vm0, %v2925_v0  ;;  %321 = vst.msk [vmem:[#allocation2 + $0x8] sm:$0xff] (!%p2615_p8), %vm319_vm0, %v2925_v0 }
  0x1a   : > { %s3016_s27 = scalar_lea.vmem %s3640_s5, %s2614_s21  ;;  %322 = vst.msk [vmem:[#allocation2 + $0x10] sm:$0xff] (!%p2615_p8), %vm319_vm0, %v2925_v0  ;;  %323 = vst.msk [vmem:[#allocation2 + $0x18] sm:$0xff] (!%p2615_p8), %vm319_vm0, %v2925_v0 }
  0x1b   : > { %324 = vst.msk [vmem:[#allocation2 + $0x20] sm:$0xff] (!%p2615_p8), %vm319_vm0, %v2925_v0  ;;  %325 = vst.msk [vmem:[#allocation2 + $0x28] sm:$0xff] (!%p2615_p8), %vm319_vm0, %v2925_v0 }
  0x1c   : > { %326 = vst.msk [vmem:[#allocation2 + $0x30] sm:$0xff] (!%p2615_p8), %vm319_vm0, %v2925_v0  ;;  %327 = vst.msk [vmem:[#allocation2 + $0x38] sm:$0xff] (!%p2615_p8), %vm319_vm0, %v2925_v0 }
  0x20 PF: > { %p2616_p9 = scmp.lt.s32.totalorder %s2989_s25, %s2987_s1 }
  0x21   : > { %v2859_v1 = vld [vmem:[%s3005_s15] sm:$0xff] (!%p2616_p9)   ;;  %v2926_v2 = vmov (!%p2616_p9), 0.0   ;;  %vm366_vm1 = vcmask (!%p2616_p9), 130048   ;;  %v2860_v3 = vld [vmem:[%s3005_s15 + $0x8] sm:$0xff] (!%p2616_p9)   ;;  %vm2927_vm2 = vmmov (!%p2616_p9), 0   ;;  %v2863_v7 = vld [vmem:[%s3005_s15 + $0x10] sm:$0xff] (!%p2616_p9)   ;;  %v602_v16 = vlaneseq (!%p2616_p9) }
  0x22   : > { %331 = sbr.rel (%p2616_p9) target bundleno = 489 (0x1e9), region = 40  ;;  %2731 = vmatprep.subr.bf16.mxu0 (!%p2616_p9), %v2926_v2  ;;  %2737 = vmatprep.subr.bf16.mxu1 (!%p2616_p9), %v2926_v2  ;;  %v371_v4 = vsel (!%p2616_p9), %vm366_vm1, %v2859_v1, 0  ;;  %v428_v5 = vsel (!%p2616_p9), %vm366_vm1, %v2860_v3, 0  ;;  %v2861_v6 = vld [vmem:[%s3000_s11] sm:$0xff] (!%p2616_p9)   ;;  %v2864_v8 = vld [vmem:[%s3005_s15 + $0x18] sm:$0xff] (!%p2616_p9)   ;;  %v2862_v9 = vld [vmem:[%s3000_s11 + $0x8] sm:$0xff] (!%p2616_p9)   ;;  %v605_v20 = vstv (!%p2616_p9), %s2994_s30 }
  0x23   : > { %2732 = vmatpush3.bf16.xpose.msra.mxu0 (!%p2616_p9), %v371_v4  ;;  %2733 = vmatprep.mubr.msk.bf16.mxu0 (!%p2616_p9), %vm2927_vm2, %v2926_v2  ;;  %v485_v10 = vsel (!%p2616_p9), %vm366_vm1, %v2863_v7, 0  ;;  %v542_v11 = vsel (!%p2616_p9), %vm366_vm1, %v2864_v8, 0  ;;  %v2865_v12 = vld [vmem:[%s3000_s11 + $0x10] sm:$0xff] (!%p2616_p9)   ;;  %v2866_v13 = vld [vmem:[%s3000_s11 + $0x18] sm:$0xff] (!%p2616_p9)   ;;  %v2867_v14 = vld [vmem:[%s3010_s18] sm:$0xff] (!%p2616_p9)   ;;  %v603_v17 = vshrl.u32 (!%p2616_p9), %v602_v16, 7 }
  0x24   : > { %2738 = vmatpush3.bf16.xpose.msra.mxu1 (!%p2616_p9), %v428_v5  ;;  %2739 = vmatprep.mubr.msk.bf16.mxu1 (!%p2616_p9), %vm2927_vm2, %v2926_v2  ;;  %v2868_v15 = vld [vmem:[%s3010_s18 + $0x8] sm:$0xff] (!%p2616_p9)   ;;  %s2630_s28 = sshll.u32 (!%p2616_p9), %s2989_s25, 4  ;;  %v610_v18 = vand.u32 (!%p2616_p9), 127, %v602_v16  ;;  %v2869_v43 = vld [vmem:[%s3010_s18 + $0x10] sm:$0xff] (!%p2616_p9)   ;;  %v2870_v48 = vld [vmem:[%s3010_s18 + $0x18] sm:$0xff] (!%p2616_p9)   ;;  %vm847_vm5 = vcmask (!%p2616_p9), 138240  }
  0x25   : > { %2743 = vmatprep.subr.bf16.mxu0 (!%p2616_p9), %v2926_v2  ;;  %2749 = vmatprep.subr.bf16.mxu1 (!%p2616_p9), %v2926_v2  ;;  %v604_v19 = vadd.s32 (!%p2616_p9), 8, %v603_v17  ;;  %v611_v21 = vstv (!%p2616_p9), %s2630_s28  ;;  %v606_v23 = vadd.s32 (!%p2616_p9), %v605_v20, %v603_v17  ;;  %v631_v8 = vld [vmem:[#allocation2] sm:$0xff] (!%p2616_p9) }
  0x26   : > { %v612_v24 = vadd.s32 (!%p2616_p9), %v611_v21, %v610_v18 }
  0x27   : > { %v607_v25 = vadd.s32 (!%p2616_p9), %v605_v20, %v604_v19 }
  0x28   : > { %vm613_vm3 = vcmp.ge.s32.totalorder (!%p2616_p9), %v606_v23, %v612_v24  ;;  %v635_v23 = vld [vmem:[#allocation2 + $0x20] sm:$0xff] (!%p2616_p9) }
  0x29   : > { %vm614_vm4 = vcmp.ge.s32.totalorder %v607_v25, %v612_v24  ;;  %v637_v24 = vld [vmem:[#allocation2 + $0x30] sm:$0xff] }
  0x2a   : > { %2734 = vmatmul.mubr.msk.bf16.vlgmr.msra.gmra.mrb[0].mxu0 %vm366_vm1, %v2861_v6 }
  0x2b   : > { %2740 = vmatmul.mubr.msk.bf16.vlgmr.msra.gmra.mrb[0].mxu1 %vm366_vm1, %v2862_v9  ;;  %2744 = vmatpush3.bf16.xpose.msra.mxu0 %v485_v10  ;;  %v633_v9 = vld [vmem:[#allocation2 + $0x10] sm:$0xff] }
  0x2c   : > { %2750 = vmatpush3.bf16.xpose.msra.mxu1 %v542_v11  ;;  %2745 = vmatprep.mubr.msk.bf16.mxu0 %vm2927_vm2, %v2926_v2 }
  0x2d   : > { %2751 = vmatprep.mubr.msk.bf16.mxu1 %vm2927_vm2, %v2926_v2  ;;  %2755 = vmatprep.subr.bf16.mxu0 %v2926_v2 }
  0x2e   : > { %2761 = vmatprep.subr.bf16.mxu1 %v2926_v2 }
  0x32   : > { %2746 = vmatmul.mubr.msk.bf16.vlgmr.msra.gmra.mrb[4].mxu0 %vm366_vm1, %v2865_v12 }
  0x33   : > { %2752 = vmatmul.mubr.msk.bf16.vlgmr.msra.gmra.mrb[4].mxu1 %vm366_vm1, %v2866_v13  ;;  %2757 = vmatprep.mubr.msk.bf16.mxu0 %vm2927_vm2, %v2926_v2 }
  0x34   : > { %2763 = vmatprep.mubr.msk.bf16.mxu1 %vm2927_vm2, %v2926_v2  ;;  %2756 = vmatpush3.bf16.msra.mxu0 %v2867_v14  ;;  %v634_v14 = vld [vmem:[#allocation2 + $0x18] sm:$0xff] }
  0x35   : > { %2762 = vmatpush3.bf16.msra.mxu1 %v2868_v15  ;;  %2767 = vmatprep.subr.bf16.mxu0 %v2926_v2 }
  0x36   : > { %2773 = vmatprep.subr.bf16.mxu1 %v2926_v2 }
  0xfd   : > { %v407_v22 = vpop.f32.mrb[0].mxu0 }
  0xfe   : > { %v585_v26 = vmul.f32 %v407_v22, %v407_v22  ;;  %v464_v27 = vpop.f32.mrb[0].mxu1  ;;  %v2735_v28 = vpop.f32.mrb[1].mxu0 }
  0xff   : > { %v587_v29 = vmul.f32 %v464_v27, %v464_v27  ;;  %v2741_v30 = vpop.f32.mrb[1].mxu1  ;;  %v410_v31 = vpop.f32.mrb[2].mxu0 }
 0x100   : > { %v593_v32 = vmul.f32 %v585_v26, %v585_v26  ;;  %v586_v33 = vmul.f32 %v410_v31, %v410_v31  ;;  %v467_v34 = vpop.f32.mrb[2].mxu1  ;;  %v2736_v35 = vpop.f32.mrb[3].mxu0  ;;  %v636_v26 = vld [vmem:[#allocation2 + $0x28] sm:$0xff]  ;;  %v638_v30 = vld [vmem:[#allocation2 + $0x38] sm:$0xff] }
 0x101   : > { %v595_v36 = vmul.f32 %v587_v29, %v587_v29  ;;  %v588_v37 = vmul.f32 %v467_v34, %v467_v34  ;;  %v2742_v38 = vpop.f32.mrb[3].mxu1 }
 0x102   : > { %v594_v39 = vmul.f32 %v586_v33, %v586_v33  ;;  %v619_v41 = vsel %vm613_vm3, %v593_v32, 0.0 }
 0x103   : > { %v596_v40 = vmul.f32 %v588_v37, %v588_v37  ;;  %v621_v44 = vsel %vm613_vm3, %v595_v36, 0.0 }
 0x104   : > { %v620_v42 = vsel %vm614_vm4, %v594_v39, 0.0 }
 0x105   : > { %v627_v45 = vpack.c.bf16 %v620_v42, %v619_v41  ;;  %v622_v46 = vsel %vm614_vm4, %v596_v40, 0.0  ;;  %v521_v47 = vpop.f32.mrb[4].mxu0 }
 0x106   : > { %v628_v49 = vpack.c.bf16 %v622_v46, %v621_v44  ;;  %v589_v50 = vmul.f32 %v521_v47, %v521_v47  ;;  %v578_v51 = vpop.f32.mrb[4].mxu1  ;;  %v2747_v52 = vpop.f32.mrb[5].mxu0 }
 0x107   : > { %v591_v53 = vmul.f32 %v578_v51, %v578_v51  ;;  %v2753_v54 = vpop.f32.mrb[5].mxu1  ;;  %v524_v55 = vpop.f32.mrb[6].mxu0  ;;  %2758 = vmatmul.mubr.msk.bf16.vlgmr.msra.gmra.mrb[8].mxu0 %vm366_vm1, %v627_v45 }
 0x108   : > { %v597_v56 = vmul.f32 %v589_v50, %v589_v50  ;;  %v590_v57 = vmul.f32 %v524_v55, %v524_v55  ;;  %v581_v58 = vpop.f32.mrb[6].mxu1  ;;  %2764 = vmatmul.mubr.msk.bf16.vlgmr.msra.gmra.mrb[8].mxu1 %vm366_vm1, %v628_v49  ;;  %v2748_v59 = vpop.f32.mrb[7].mxu0  ;;  %2768 = vmatpush3.bf16.msra.mxu0 %v2869_v43 }
 0x109   : > { %v599_v60 = vmul.f32 %v591_v53, %v591_v53  ;;  %v592_v61 = vmul.f32 %v581_v58, %v581_v58  ;;  %v2754_v62 = vpop.f32.mrb[7].mxu1  ;;  %2774 = vmatpush3.bf16.msra.mxu1 %v2870_v48  ;;  %2769 = vmatprep.mubr.msk.bf16.mxu0 %vm2927_vm2, %v2926_v2 }
 0x10a   : > { %v598_v63 = vmul.f32 %v590_v57, %v590_v57  ;;  %2775 = vmatprep.mubr.msk.bf16.mxu1 %vm2927_vm2, %v2926_v2  ;;  %v623_v1 = vsel %vm613_vm3, %v597_v56, 0.0  ;;  %v632_v2 = vld [vmem:[#allocation2 + $0x8] sm:$0xff] }
 0x10b   : > { %v600_v0 = vmul.f32 %v592_v61, %v592_v61  ;;  %v625_v4 = vsel %vm613_vm3, %v599_v60, 0.0 }
 0x10c   : > { %v624_v3 = vsel %vm614_vm4, %v598_v63, 0.0 }
 0x10d   : > { %v629_v5 = vpack.c.bf16 %v624_v3, %v623_v1  ;;  %v626_v6 = vsel %vm614_vm4, %v600_v0, 0.0 }
 0x10e   : > { %v630_v7 = vpack.c.bf16 %v626_v6, %v625_v4 }
 0x10f   : > { %2770 = vmatmul.mubr.msk.bf16.vlgmr.msra.gmra.mrb[12].mxu0 %vm366_vm1, %v629_v5 }
 0x110   : > { %2776 = vmatmul.mubr.msk.bf16.vlgmr.msra.gmra.mrb[12].mxu1 %vm366_vm1, %v630_v7 }
 0x1da   : > { %v682_v10 = vpop.f32.mrb[8].mxu0 }
 0x1db   : > { %v839_v11 = vadd.f32 %v682_v10, %v631_v8  ;;  %v732_v12 = vpop.f32.mrb[8].mxu1  ;;  %v2759_v13 = vpop.f32.mrb[9].mxu0 }
 0x1dc   : > { %v841_v15 = vadd.f32 %v732_v12, %v633_v9  ;;  %v2765_v16 = vpop.f32.mrb[9].mxu1  ;;  %v685_v17 = vpop.f32.mrb[10].mxu0 }
 0x1dd   : > { %848 = vst.msk [vmem:[#allocation2] sm:$0xff] %vm847_vm5, %v839_v11  ;;  %v840_v18 = vadd.f32 %v685_v17, %v632_v2  ;;  %v735_v19 = vpop.f32.mrb[10].mxu1  ;;  %v2760_v20 = vpop.f32.mrb[11].mxu0 }
 0x1de   : > { %850 = vst.msk [vmem:[#allocation2 + $0x10] sm:$0xff] %vm847_vm5, %v841_v15  ;;  %v842_v21 = vadd.f32 %v735_v19, %v634_v14  ;;  %v2766_v22 = vpop.f32.mrb[11].mxu1 }
 0x1df   : > { %849 = vst.msk [vmem:[#allocation2 + $0x8] sm:$0xff] %vm847_vm5, %v840_v18 }
 0x1e0   : > { %851 = vst.msk [vmem:[#allocation2 + $0x18] sm:$0xff] %vm847_vm5, %v842_v21 }
 0x1e2   : > { %v782_v25 = vpop.f32.mrb[12].mxu0 }
 0x1e3   : > { %v843_v27 = vadd.f32 %v782_v25, %v635_v23  ;;  %v832_v28 = vpop.f32.mrb[12].mxu1  ;;  %v2771_v29 = vpop.f32.mrb[13].mxu0 }
 0x1e4   : > { %v845_v31 = vadd.f32 %v832_v28, %v637_v24  ;;  %v2777_v32 = vpop.f32.mrb[13].mxu1  ;;  %v785_v33 = vpop.f32.mrb[14].mxu0 }
 0x1e5   : > { %852 = vst.msk [vmem:[#allocation2 + $0x20] sm:$0xff] %vm847_vm5, %v843_v27  ;;  %v844_v34 = vadd.f32 %v785_v33, %v636_v26  ;;  %v835_v35 = vpop.f32.mrb[14].mxu1  ;;  %v2772_v36 = vpop.f32.mrb[15].mxu0 }
 0x1e6   : > { %854 = vst.msk [vmem:[#allocation2 + $0x30] sm:$0xff] %vm847_vm5, %v845_v31  ;;  %v846_v37 = vadd.f32 %v835_v35, %v638_v30  ;;  %v2778_v38 = vpop.f32.mrb[15].mxu1 }
 0x1e7   : > { %853 = vst.msk [vmem:[#allocation2 + $0x28] sm:$0xff] %vm847_vm5, %v844_v34 }
 0x1e8   : > { %855 = vst.msk [vmem:[#allocation2 + $0x38] sm:$0xff] %vm847_vm5, %v846_v37 }
 0x1e9 PF: > { %p2639_p10 = scmp.ge.s32.totalorder %s2989_s25, %s2987_s1 }
 0x1ea   : > { %v2871_v39 = vld [vmem:[%s3005_s15] sm:$0xff] (!%p2639_p10)   ;;  %v2928_v40 = vmov (!%p2639_p10), 0.0   ;;  %vm894_vm6 = vcmask (!%p2639_p10), 130048   ;;  %v2872_v41 = vld [vmem:[%s3005_s15 + $0x8] sm:$0xff] (!%p2639_p10)   ;;  %vm2929_vm7 = vmmov (!%p2639_p10), 0   ;;  %v2875_v45 = vld [vmem:[%s3005_s15 + $0x10] sm:$0xff] (!%p2639_p10)  }
 0x1eb   : > { %859 = sbr.rel (%p2639_p10) target bundleno = 945 (0x3b1), region = 44  ;;  %2779 = vmatprep.subr.bf16.mxu0 (!%p2639_p10), %v2928_v40  ;;  %2785 = vmatprep.subr.bf16.mxu1 (!%p2639_p10), %v2928_v40  ;;  %v899_v42 = vsel (!%p2639_p10), %vm894_vm6, %v2871_v39, 0  ;;  %v956_v43 = vsel (!%p2639_p10), %vm894_vm6, %v2872_v41, 0  ;;  %v2873_v44 = vld [vmem:[%s3000_s11] sm:$0xff] (!%p2639_p10)   ;;  %v2876_v46 = vld [vmem:[%s3005_s15 + $0x18] sm:$0xff] (!%p2639_p10)   ;;  %v2874_v47 = vld [vmem:[%s3000_s11 + $0x8] sm:$0xff] (!%p2639_p10)  }
 0x1ec   : > { %2780 = vmatpush3.bf16.xpose.msra.mxu0 (!%p2639_p10), %v899_v42  ;;  %2781 = vmatprep.mubr.msk.bf16.mxu0 (!%p2639_p10), %vm2929_vm7, %v2928_v40  ;;  %v1013_v48 = vsel (!%p2639_p10), %vm894_vm6, %v2875_v45, 0  ;;  %v1070_v49 = vsel (!%p2639_p10), %vm894_vm6, %v2876_v46, 0  ;;  %v2877_v50 = vld [vmem:[%s3000_s11 + $0x10] sm:$0xff] (!%p2639_p10)   ;;  %v2878_v51 = vld [vmem:[%s3000_s11 + $0x18] sm:$0xff] (!%p2639_p10)   ;;  %v2879_v52 = vld [vmem:[%s3010_s18] sm:$0xff] (!%p2639_p10)   ;;  %vm1349_vm8 = vcmask (!%p2639_p10), 138240  }
 0x1ed   : > { %2786 = vmatpush3.bf16.xpose.msra.mxu1 (!%p2639_p10), %v956_v43  ;;  %2787 = vmatprep.mubr.msk.bf16.mxu1 (!%p2639_p10), %vm2929_vm7, %v2928_v40  ;;  %v2880_v53 = vld [vmem:[%s3010_s18 + $0x8] sm:$0xff] (!%p2639_p10)   ;;  %v2881_v7 = vld [vmem:[%s3010_s18 + $0x10] sm:$0xff] (!%p2639_p10)   ;;  %v2882_v9 = vld [vmem:[%s3010_s18 + $0x18] sm:$0xff] (!%p2639_p10)  }
 0x1ee   : > { %2791 = vmatprep.subr.bf16.mxu0 (!%p2639_p10), %v2928_v40  ;;  %2797 = vmatprep.subr.bf16.mxu1 (!%p2639_p10), %v2928_v40  ;;  %v1133_v28 = vld [vmem:[#allocation2] sm:$0xff] (!%p2639_p10)  ;;  %v1135_v29 = vld [vmem:[#allocation2 + $0x10] sm:$0xff] (!%p2639_p10)  ;;  %v1134_v31 = vld [vmem:[#allocation2 + $0x8] sm:$0xff] (!%p2639_p10) }
 0x1ef   : > { %v1136_v35 = vld [vmem:[#allocation2 + $0x18] sm:$0xff] (!%p2639_p10)  ;;  %v1139_v45 = vld [vmem:[#allocation2 + $0x30] sm:$0xff] (!%p2639_p10) }
 0x1f3   : > { %2782 = vmatmul.mubr.msk.bf16.vlgmr.msra.gmra.mrb[0].mxu0 %vm894_vm6, %v2873_v44  ;;  %v1137_v44 = vld [vmem:[#allocation2 + $0x20] sm:$0xff] }
 0x1f4   : > { %2788 = vmatmul.mubr.msk.bf16.vlgmr.msra.gmra.mrb[0].mxu1 %vm894_vm6, %v2874_v47  ;;  %2792 = vmatpush3.bf16.xpose.msra.mxu0 %v1013_v48  ;;  %v1138_v47 = vld [vmem:[#allocation2 + $0x28] sm:$0xff] }
 0x1f5   : > { %2798 = vmatpush3.bf16.xpose.msra.mxu1 %v1070_v49  ;;  %2793 = vmatprep.mubr.msk.bf16.mxu0 %vm2929_vm7, %v2928_v40 }
 0x1f6   : > { %2799 = vmatprep.mubr.msk.bf16.mxu1 %vm2929_vm7, %v2928_v40  ;;  %2803 = vmatprep.subr.bf16.mxu0 %v2928_v40 }
 0x1f7   : > { %2809 = vmatprep.subr.bf16.mxu1 %v2928_v40 }
 0x1fb   : > { %2794 = vmatmul.mubr.msk.bf16.vlgmr.msra.gmra.mrb[4].mxu0 %vm894_vm6, %v2877_v50 }
 0x1fc   : > { %2800 = vmatmul.mubr.msk.bf16.vlgmr.msra.gmra.mrb[4].mxu1 %vm894_vm6, %v2878_v51  ;;  %2805 = vmatprep.mubr.msk.bf16.mxu0 %vm2929_vm7, %v2928_v40  ;;  %v1140_v51 = vld [vmem:[#allocation2 + $0x38] sm:$0xff] }
 0x1fd   : > { %2811 = vmatprep.mubr.msk.bf16.mxu1 %vm2929_vm7, %v2928_v40  ;;  %2804 = vmatpush3.bf16.msra.mxu0 %v2879_v52 }
 0x1fe   : > { %2810 = vmatpush3.bf16.msra.mxu1 %v2880_v53  ;;  %2815 = vmatprep.subr.bf16.mxu0 %v2928_v40 }
 0x1ff   : > { %2821 = vmatprep.subr.bf16.mxu1 %v2928_v40 }
 0x2c6   : > { %v935_v54 = vpop.f32.mrb[0].mxu0 }
 0x2c7   : > { %v1113_v55 = vmul.f32 %v935_v54, %v935_v54  ;;  %v992_v56 = vpop.f32.mrb[0].mxu1  ;;  %v2783_v57 = vpop.f32.mrb[1].mxu0 }
 0x2c8   : > { %v1115_v58 = vmul.f32 %v992_v56, %v992_v56  ;;  %v2789_v59 = vpop.f32.mrb[1].mxu1  ;;  %v938_v60 = vpop.f32.mrb[2].mxu0 }
 0x2c9   : > { %v1114_v61 = vmul.f32 %v938_v60, %v938_v60  ;;  %v995_v62 = vpop.f32.mrb[2].mxu1  ;;  %v2784_v63 = vpop.f32.mrb[3].mxu0  ;;  %v1121_v3 = vmul.f32 %v1113_v55, %v1113_v55 }
 0x2ca   : > { %v1116_v0 = vmul.f32 %v995_v62, %v995_v62  ;;  %v2790_v1 = vpop.f32.mrb[3].mxu1  ;;  %v1123_v5 = vmul.f32 %v1115_v58, %v1115_v58 }
 0x2cb   : > { %v1122_v4 = vmul.f32 %v1114_v61, %v1114_v61 }
 0x2cc   : > { %v1124_v6 = vmul.f32 %v1116_v0, %v1116_v0 }
 0x2cd   : > { %v1129_v8 = vpack.c.bf16 %v1122_v4, %v1121_v3 }
 0x2ce   : > { %v1130_v10 = vpack.c.bf16 %v1124_v6, %v1123_v5  ;;  %v1049_v2 = vpop.f32.mrb[4].mxu0 }
 0x2cf   : > { %v1117_v11 = vmul.f32 %v1049_v2, %v1049_v2  ;;  %v1106_v12 = vpop.f32.mrb[4].mxu1  ;;  %v2795_v13 = vpop.f32.mrb[5].mxu0  ;;  %2806 = vmatmul.mubr.msk.bf16.vlgmr.msra.gmra.mrb[8].mxu0 %vm894_vm6, %v1129_v8 }
 0x2d0   : > { %v1119_v14 = vmul.f32 %v1106_v12, %v1106_v12  ;;  %v2801_v15 = vpop.f32.mrb[5].mxu1  ;;  %2812 = vmatmul.mubr.msk.bf16.vlgmr.msra.gmra.mrb[8].mxu1 %vm894_vm6, %v1130_v10  ;;  %v1052_v16 = vpop.f32.mrb[6].mxu0  ;;  %2816 = vmatpush3.bf16.msra.mxu0 %v2881_v7 }
 0x2d1   : > { %v1118_v17 = vmul.f32 %v1052_v16, %v1052_v16  ;;  %v1109_v18 = vpop.f32.mrb[6].mxu1  ;;  %2822 = vmatpush3.bf16.msra.mxu1 %v2882_v9  ;;  %v2796_v19 = vpop.f32.mrb[7].mxu0  ;;  %2817 = vmatprep.mubr.msk.bf16.mxu0 %vm2929_vm7, %v2928_v40  ;;  %v1125_v22 = vmul.f32 %v1117_v11, %v1117_v11 }
 0x2d2   : > { %v1120_v20 = vmul.f32 %v1109_v18, %v1109_v18  ;;  %v2802_v21 = vpop.f32.mrb[7].mxu1  ;;  %2823 = vmatprep.mubr.msk.bf16.mxu1 %vm2929_vm7, %v2928_v40  ;;  %v1127_v24 = vmul.f32 %v1119_v14, %v1119_v14 }
 0x2d3   : > { %v1126_v23 = vmul.f32 %v1118_v17, %v1118_v17 }
 0x2d4   : > { %v1128_v25 = vmul.f32 %v1120_v20, %v1120_v20 }
 0x2d5   : > { %v1131_v26 = vpack.c.bf16 %v1126_v23, %v1125_v22 }
 0x2d6   : > { %v1132_v27 = vpack.c.bf16 %v1128_v25, %v1127_v24 }
 0x2d7   : > { %2818 = vmatmul.mubr.msk.bf16.vlgmr.msra.gmra.mrb[12].mxu0 %vm894_vm6, %v1131_v26 }
 0x2d8   : > { %2824 = vmatmul.mubr.msk.bf16.vlgmr.msra.gmra.mrb[12].mxu1 %vm894_vm6, %v1132_v27 }
 0x3a2   : > { %v1184_v30 = vpop.f32.mrb[8].mxu0 }
 0x3a3   : > { %v1341_v32 = vadd.f32 %v1184_v30, %v1133_v28  ;;  %v1234_v33 = vpop.f32.mrb[8].mxu1  ;;  %v2807_v34 = vpop.f32.mrb[9].mxu0 }
 0x3a4   : > { %v1343_v36 = vadd.f32 %v1234_v33, %v1135_v29  ;;  %v2813_v37 = vpop.f32.mrb[9].mxu1  ;;  %v1187_v38 = vpop.f32.mrb[10].mxu0 }
 0x3a5   : > { %1350 = vst.msk [vmem:[#allocation2] sm:$0xff] %vm1349_vm8, %v1341_v32  ;;  %v1342_v39 = vadd.f32 %v1187_v38, %v1134_v31  ;;  %v1237_v40 = vpop.f32.mrb[10].mxu1  ;;  %v2808_v41 = vpop.f32.mrb[11].mxu0 }
 0x3a6   : > { %1352 = vst.msk [vmem:[#allocation2 + $0x10] sm:$0xff] %vm1349_vm8, %v1343_v36  ;;  %v1344_v42 = vadd.f32 %v1237_v40, %v1136_v35  ;;  %v2814_v43 = vpop.f32.mrb[11].mxu1 }
 0x3a7   : > { %1351 = vst.msk [vmem:[#allocation2 + $0x8] sm:$0xff] %vm1349_vm8, %v1342_v39 }
 0x3a8   : > { %1353 = vst.msk [vmem:[#allocation2 + $0x18] sm:$0xff] %vm1349_vm8, %v1344_v42 }
 0x3aa   : > { %v1284_v46 = vpop.f32.mrb[12].mxu0 }
 0x3ab   : > { %v1345_v48 = vadd.f32 %v1284_v46, %v1137_v44  ;;  %v1334_v49 = vpop.f32.mrb[12].mxu1  ;;  %v2819_v50 = vpop.f32.mrb[13].mxu0 }
 0x3ac   : > { %v1347_v52 = vadd.f32 %v1334_v49, %v1139_v45  ;;  %v2825_v53 = vpop.f32.mrb[13].mxu1  ;;  %v1287_v54 = vpop.f32.mrb[14].mxu0 }
 0x3ad   : > { %1354 = vst.msk [vmem:[#allocation2 + $0x20] sm:$0xff] %vm1349_vm8, %v1345_v48  ;;  %v1346_v55 = vadd.f32 %v1287_v54, %v1138_v47  ;;  %v1337_v56 = vpop.f32.mrb[14].mxu1  ;;  %v2820_v57 = vpop.f32.mrb[15].mxu0 }
 0x3ae   : > { %1356 = vst.msk [vmem:[#allocation2 + $0x30] sm:$0xff] %vm1349_vm8, %v1347_v52  ;;  %v1348_v58 = vadd.f32 %v1337_v56, %v1140_v51  ;;  %v2826_v59 = vpop.f32.mrb[15].mxu1 }
 0x3af   : > { %1355 = vst.msk [vmem:[#allocation2 + $0x28] sm:$0xff] %vm1349_vm8, %v1346_v55 }
 0x3b0   : > { %1357 = vst.msk [vmem:[#allocation2 + $0x38] sm:$0xff] %vm1349_vm8, %v1348_v58 }
 0x3b1 PF: > { %p2660_p11 = scmp.ne.s32.totalorder %s2989_s25, %s2987_s1 }
 0x3b2   : > { %v1362_v61 = vld [vmem:[#allocation2] sm:$0xff] (!%p2660_p11)  ;;  %v2930_v62 = vmov (!%p2660_p11), 16   ;;  %v1363_v0 = vld [vmem:[#allocation2 + $0x8] sm:$0xff] (!%p2660_p11)  ;;  %v1365_v1 = vld [vmem:[#allocation2 + $0x18] sm:$0xff] (!%p2660_p11)  ;;  %v2931_v10 = vmov (!%p2660_p11), 1966171168   ;;  %v1390_v11 = vlaneseq (!%p2660_p11) }
 0x3b3   : > { %1361 = sbr.rel (%p2660_p11) target bundleno = 1176 (0x498), region = 48  ;;  %2884 = vset.pattern.permute.xlu1 (!%p2660_p11), %v2930_v62  ;;  %2883 = vset.pattern.permute.xlu0 (!%p2660_p11), %v2930_v62  ;;  %v1364_v3 = vld [vmem:[#allocation2 + $0x10] sm:$0xff] (!%p2660_p11)  ;;  %v1388_v2 = vunpack.c.l.s4 (!%p2660_p11), %v2931_v10  ;;  %v2932_v16 = vmov (!%p2660_p11), 857870592   ;;  %vm2146_vm9 = vcmask (!%p2660_p11), 123905   ;;  %vm1595_vm12 = vcmask (!%p2660_p11), 122880  }
 0x3b4   : > { %v1366_v60 = vld [vmem:[#allocation2 + $0x20] sm:$0xff] (!%p2660_p11)  ;;  %1372 = vperm.xlu0 (!%p2660_p11), %2883, %v1362_v61   ;;  %v1391_v15 = vshrl.u32 (!%p2660_p11), %v1390_v11, 7  ;;  %v1468_v17 = vunpack.c.l.s4 (!%p2660_p11), %v2932_v16  ;;  %vm2147_vm10 = vsmask.f32 (!%p2660_p11), 1280  ;;  %vm1596_vm13 = vsmask.f32 (!%p2660_p11), 256 }
 0x3b5   : > { %1923 = vperm.xlu1 (!%p2660_p11), %2884, %v1366_v60   ;;  %v3149_v5 = vld [vmem:[#allocation2 + $0x30] sm:$0xff] (!%p2660_p11)  ;;  %v1389_v14 = vunpack.c.0.s8 (!%p2660_p11), %v1388_v2  ;;  %vm3195_vm11 = vmand (!%p2660_p11), %vm2146_vm9, %vm2147_vm10  ;;  %vm1871_vm15 = vsmask.f32 (!%p2660_p11), 7938  ;;  %vm2422_vm1 = vsmask.f32 (!%p2660_p11), 7942 }
 0x3b6   : > { %v1367_v63 = vld [vmem:[#allocation2 + $0x28] sm:$0xff] (!%p2660_p11)  ;;  %v1469_v24 = vunpack.c.0.s8 (!%p2660_p11), %v1468_v17  ;;  %vm3304_vm14 = vmand (!%p2660_p11), %vm1595_vm12, %vm1596_vm13 }
 0x3b7   : > { %v3147_v4 = vld [vmem:[#allocation2 + $0x38] sm:$0xff] (!%p2660_p11)  ;;  %v3153_v23 = vsub.s32 (!%p2660_p11), %v1389_v14, %v1391_v15  ;;  %vm3420_vm0 = vmand (!%p2660_p11), %vm1595_vm12, %vm1871_vm15 }
 0x3b8   : > { %1377 = vperm.xlu0 (!%p2660_p11), %2883, %v1363_v0   ;;  %v3155_v36 = vsub.s32 (!%p2660_p11), %v1469_v24, %v1391_v15  ;;  %vm3534_vm2 = vmand (!%p2660_p11), %vm2146_vm9, %vm2422_vm1 }
 0x3b9   : > { %1928 = vperm.xlu1 (!%p2660_p11), %2884, %v1367_v63  }
 0x3bc   : > { %1648 = vperm.xlu0 %2883, %v1364_v3  }
 0x3bd   : > { %1653 = vperm.xlu1 %2884, %v1365_v1  }
 0x3c0   : > { %2199 = vperm.xlu0 %2883, %v3149_v5  }
 0x3c1   : > { %2204 = vperm.xlu1 %2884, %v3147_v4  }
 0x433   : > { %v1373_v7 = vpop.permute.xlu0 %1372 }
 0x434   : > { %v1924_v6 = vpop.permute.xlu1 %1923 }
 0x435   : > { %2885 = vrcp.f32 %v1924_v6 }
 0x436   : > { %2887 = vrcp.f32 %v1373_v7 }
 0x437   : > { %v1378_v9 = vpop.permute.xlu0 %1377 }
 0x438   : > { %v1929_v8 = vpop.permute.xlu1 %1928 }
 0x439   : > { %2889 = vrcp.f32 %v1929_v8 }
 0x43a   : > { %2891 = vrcp.f32 %v1378_v9 }
 0x43b   : > { %v1649_v13 = vpop.permute.xlu0 %1648 }
 0x43c   : > { %v1654_v12 = vpop.permute.xlu1 %1653 }
 0x43d   : > { %2893 = vrcp.f32 %v1654_v12 }
 0x43e   : > { %2895 = vrcp.f32 %v1649_v13 }
 0x43f   : > { %v2886_v18 = vpop.eup %2885  ;;  %v2200_v29 = vpop.permute.xlu0 %2199 }
 0x440   : > { %v2888_v19 = vpop.eup %2887  ;;  %v1932_v22 = vmul.f32 %v2886_v18, %v1366_v60  ;;  %v2205_v26 = vpop.permute.xlu1 %2204 }
 0x441   : > { %v1381_v27 = vmul.f32 %v2888_v19, %v1362_v61  ;;  %2897 = vrcp.f32 %v2205_v26 }
 0x442   : > { %2899 = vrcp.f32 %v2200_v29  ;;  %v2161_v29 = vld [vmem:[%s3016_s27 + $0x8] sm:$0x2] }
 0x443   : > { %v2890_v20 = vpop.eup %2889 }
 0x444   : > { %v2892_v21 = vpop.eup %2891  ;;  %v1934_v25 = vmul.f32 %v2890_v20, %v1367_v63  ;;  %v2149_v20 = vld [vmem:[%s3016_s27] sm:$0x2] }
 0x445   : > { %v1383_v28 = vmul.f32 %v2892_v21, %v1363_v0  ;;  %v2152_v21 = vld [vmem:[%s3016_s27 + $0x2] sm:$0x2] }
 0x446   : > { %v1935_v30 = vpack.c.bf16 %v1934_v25, %v1932_v22  ;;  %v2679_v31 = vpack.c.bf16 %v1934_v25, %v1934_v25 }
 0x447   : > { %v2894_v32 = vpop.eup %2893  ;;  %v1384_v33 = vpack.c.bf16 %v1383_v28, %v1381_v27  ;;  %v2661_v34 = vpack.c.bf16 %v1383_v28, %v1383_v28  ;;  %v2155_v27 = vld [vmem:[%s3016_s27 + $0x4] sm:$0x2]  ;;  %v2158_v28 = vld [vmem:[%s3016_s27 + $0x6] sm:$0x2] }
 0x448   : > { %v2896_v35 = vpop.eup %2895  ;;  %v1944_v37 = vrot.slane %v1935_v30, %v3153_v23  ;;  %v1951_v38 = vrot.slane %v2679_v31, %v3153_v23  ;;  %v3165_v41 = vmul.f32 %v2894_v32, %v1365_v1 }
 0x449   : > { %v3160_v39 = vrot.slane %v1384_v33, %v3153_v23  ;;  %v3163_v40 = vrot.slane %v2661_v34, %v3153_v23  ;;  %v3167_v42 = vmul.f32 %v2896_v35, %v1364_v3  ;;  %v2164_v34 = vld [vmem:[%s3016_s27 + $0xa] sm:$0x2]  ;;  %v2167_v35 = vld [vmem:[%s3016_s27 + $0xc] sm:$0x2] }
 0x44a   : > { %v1952_v43 = vcombine.high %v1944_v37, %v1944_v37  ;;  %v1953_v44 = vcombine.high %v1951_v38, %v1951_v38  ;;  %v1960_v45 = vrot.slane %v1944_v37, %v3153_v23  ;;  %v1967_v46 = vrot.slane %v1951_v38, %v3153_v23  ;;  %v2170_v37 = vld [vmem:[%s3016_s27 + $0xe] sm:$0x2] }
 0x44b   : > { %v1401_v47 = vcombine.high %v3160_v39, %v3160_v39  ;;  %v1402_v48 = vcombine.high %v3163_v40, %v3163_v40  ;;  %v3177_v49 = vrot.slane %v3160_v39, %v3153_v23  ;;  %v3181_v50 = vrot.slane %v3163_v40, %v3153_v23  ;;  %v3185_v10 = vpop.eup %2897 }
 0x44c   : > { %v1974_v51 = vrot.slane %v1952_v43, %v3153_v23  ;;  %v1981_v52 = vrot.slane %v1953_v44, %v3153_v23  ;;  %v1982_v53 = vcombine.high %v1960_v45, %v1960_v45  ;;  %v1983_v54 = vcombine.high %v1967_v46, %v1967_v46  ;;  %v3187_v14 = vpop.eup %2899 }
 0x44d   : > { %v1987_v55 = vunpack.i.h.s16 %v1960_v45  ;;  %v1995_v56 = vunpack.i.h.s16 %v1967_v46  ;;  %v2680_v57 = vpack.i.b16 %v1960_v45, %v1960_v45  ;;  %v2684_v58 = vpack.i.b16 %v1967_v46, %v1967_v46  ;;  %v2173_v46 = vld [vmem:[%s3016_s27 + $0x10] sm:$0x2] }
 0x44e   : > { %v1984_v59 = vcombine.high %v1974_v51, %v1974_v51  ;;  %v1985_v60 = vcombine.high %v1981_v52, %v1981_v52  ;;  %v1989_v61 = vunpack.i.h.s16 %v1974_v51  ;;  %v1991_v62 = vunpack.i.h.s16 %v1982_v53 }
 0x44f   : > { %v1997_v63 = vunpack.i.h.s16 %v1981_v52  ;;  %v1999_v0 = vunpack.i.h.s16 %v1983_v54  ;;  %v2003_v1 = vpack.i.b16 %v1987_v55, %v1987_v55  ;;  %v2681_v3 = vpack.i.b16 %v1974_v51, %v1974_v51  ;;  %v2176_v51 = vld [vmem:[%s3016_s27 + $0x12] sm:$0x2] }
 0x450   : > { %v1993_v6 = vunpack.i.h.s16 %v1984_v59  ;;  %v2001_v7 = vunpack.i.h.s16 %v1985_v60  ;;  %v2005_v8 = vpack.i.b16 %v1989_v61, %v1989_v61  ;;  %v2682_v9 = vpack.i.b16 %v1982_v53, %v1982_v53 }
 0x451   : > { %v2007_v2 = vpack.i.b16 %v1991_v62, %v1991_v62  ;;  %v2683_v11 = vpack.i.b16 %v1984_v59, %v1984_v59  ;;  %v2011_v12 = vpack.i.b16 %v1995_v56, %v1995_v56  ;;  %v2685_v13 = vpack.i.b16 %v1981_v52, %v1981_v52  ;;  %v2179_v52 = vld [vmem:[%s3016_s27 + $0x14] sm:$0x2]  ;;  %v2188_v59 = vld [vmem:[%s3016_s27 + $0x1a] sm:$0x2] }
 0x452   : > { %v2009_v15 = vpack.i.b16 %v1993_v6, %v1993_v6  ;;  %v3189_v16 = vpack.i.b16 %v1997_v63, %v1997_v63  ;;  %v2686_v17 = vpack.i.b16 %v1983_v54, %v1983_v54  ;;  %v3191_v18 = vpack.i.b16 %v1999_v0, %v1999_v0  ;;  %v2191_v0 = vld [vmem:[%s3016_s27 + $0x1c] sm:$0x2] }
 0x453   : > { %v2687_v22 = vpack.i.b16 %v1985_v60, %v1985_v60  ;;  %v3201_v24 = vpack.i.b16 %v2001_v7, %v2001_v7  ;;  %v2024_v25 = vrot.slane %v2680_v57, %v3155_v36  ;;  %v2031_v26 = vrot.slane %v2003_v1, %v3155_v36  ;;  %v2182_v57 = vld [vmem:[%s3016_s27 + $0x16] sm:$0x2]  ;;  %v2194_v1 = vld [vmem:[%s3016_s27 + $0x1e] sm:$0x2] }
 0x454   : > { %v2038_v30 = vrot.slane %v2681_v3, %v3155_v36  ;;  %v2045_v31 = vrot.slane %v2005_v8, %v3155_v36  ;;  %v2052_v32 = vrot.slane %v2682_v9, %v3155_v36  ;;  %v2059_v33 = vrot.slane %v2007_v2, %v3155_v36 }
 0x455   : > { %v2066_v38 = vrot.slane %v2683_v11, %v3155_v36  ;;  %v2073_v43 = vrot.slane %v2009_v15, %v3155_v36  ;;  %v2080_v44 = vrot.slane %v2684_v58, %v3155_v36  ;;  %v2087_v45 = vrot.slane %v2011_v12, %v3155_v36  ;;  %v2185_v58 = vld [vmem:[%s3016_s27 + $0x18] sm:$0x2] }
 0x456   : > { %v2094_v53 = vrot.slane %v2685_v13, %v3155_v36  ;;  %v2101_v54 = vrot.slane %v3189_v16, %v3155_v36  ;;  %v2108_v55 = vrot.slane %v2686_v17, %v3155_v36  ;;  %v2115_v56 = vrot.slane %v3191_v18, %v3155_v36 }
 0x457   : > { %v2122_v60 = vrot.slane %v2687_v22, %v3155_v36  ;;  %v2129_v61 = vrot.slane %v3201_v24, %v3155_v36  ;;  %v2150_v62 = vsel %vm3195_vm11, %v2024_v25, %v2149_v20  ;;  %v2153_v63 = vsel %vm3195_vm11, %v2031_v26, %v2152_v21 }
 0x458   : > { %2151 = vst [vmem:[%s3016_s27] sm:$0x2] %v2150_v62  ;;  %2154 = vst [vmem:[%s3016_s27 + $0x2] sm:$0x2] %v2153_v63  ;;  %v2156_v3 = vsel %vm3195_vm11, %v2038_v30, %v2155_v27  ;;  %v2159_v6 = vsel %vm3195_vm11, %v2045_v31, %v2158_v28  ;;  %v2162_v7 = vsel %vm3195_vm11, %v2052_v32, %v2161_v29  ;;  %v1436_v19 = vunpack.i.h.s16 %v3177_v49  ;;  %v1607_v62 = vld [vmem:[%s3016_s27 + $0x6] sm:$0x1] }
 0x459   : > { %v2165_v8 = vsel %vm3195_vm11, %v2059_v33, %v2164_v34  ;;  %2157 = vst [vmem:[%s3016_s27 + $0x4] sm:$0x2] %v2156_v3  ;;  %2160 = vst [vmem:[%s3016_s27 + $0x6] sm:$0x2] %v2159_v6  ;;  %v2168_v9 = vsel %vm3195_vm11, %v2066_v38, %v2167_v35  ;;  %v2171_v2 = vsel %vm3195_vm11, %v2073_v43, %v2170_v37  ;;  %v1444_v26 = vunpack.i.h.s16 %v3181_v50  ;;  %v1610_v63 = vld [vmem:[%s3016_s27 + $0x8] sm:$0x1] }
 0x45a   : > { %2163 = vst [vmem:[%s3016_s27 + $0x8] sm:$0x2] %v2162_v7  ;;  %2166 = vst [vmem:[%s3016_s27 + $0xa] sm:$0x2] %v2165_v8  ;;  %v2174_v11 = vsel %vm3195_vm11, %v2080_v44, %v2173_v46  ;;  %v2177_v12 = vsel %vm3195_vm11, %v2087_v45, %v2176_v51  ;;  %v2180_v13 = vsel %vm3195_vm11, %v2094_v53, %v2179_v52 }
 0x45b   : > { %2169 = vst [vmem:[%s3016_s27 + $0xc] sm:$0x2] %v2168_v9  ;;  %2172 = vst [vmem:[%s3016_s27 + $0xe] sm:$0x2] %v2171_v2  ;;  %v2183_v15 = vsel %vm3195_vm11, %v2101_v54, %v2182_v57  ;;  %v2186_v16 = vsel %vm3195_vm11, %v2108_v55, %v2185_v58  ;;  %v2189_v17 = vsel %vm3195_vm11, %v2115_v56, %v2188_v59  ;;  %v1601_v56 = vld [vmem:[%s3016_s27 + $0x2] sm:$0x1] }
 0x45c   : > { %2175 = vst [vmem:[%s3016_s27 + $0x10] sm:$0x2] %v2174_v11  ;;  %2178 = vst [vmem:[%s3016_s27 + $0x12] sm:$0x2] %v2177_v12  ;;  %v2192_v18 = vsel %vm3195_vm11, %v2122_v60, %v2191_v0  ;;  %v2195_v20 = vsel %vm3195_vm11, %v2129_v61, %v2194_v1  ;;  %v1423_v21 = vrot.slane %v1401_v47, %v3153_v23  ;;  %v1604_v57 = vld [vmem:[%s3016_s27 + $0x4] sm:$0x1] }
 0x45d   : > { %2181 = vst [vmem:[%s3016_s27 + $0x14] sm:$0x2] %v2180_v13  ;;  %2184 = vst [vmem:[%s3016_s27 + $0x16] sm:$0x2] %v2183_v15  ;;  %v1430_v22 = vrot.slane %v1402_v48, %v3153_v23  ;;  %v1431_v24 = vcombine.high %v3177_v49, %v3177_v49  ;;  %v1432_v25 = vcombine.high %v3181_v50, %v3181_v50  ;;  %v1622_v0 = vld [vmem:[%s3016_s27 + $0x10] sm:$0x1] }
 0x45e   : > { %2187 = vst [vmem:[%s3016_s27 + $0x18] sm:$0x2] %v2186_v16  ;;  %2190 = vst [vmem:[%s3016_s27 + $0x1a] sm:$0x2] %v2189_v17  ;;  %v1433_v27 = vcombine.high %v1423_v21, %v1423_v21  ;;  %v1438_v47 = vunpack.i.h.s16 %v1423_v21  ;;  %v2662_v40 = vpack.i.b16 %v3177_v49, %v3177_v49  ;;  %v1452_v48 = vpack.i.b16 %v1436_v19, %v1436_v19  ;;  %v1625_v1 = vld [vmem:[%s3016_s27 + $0x12] sm:$0x1] }
 0x45f   : > { %2193 = vst [vmem:[%s3016_s27 + $0x1c] sm:$0x2] %v2192_v18  ;;  %2196 = vst [vmem:[%s3016_s27 + $0x1e] sm:$0x2] %v2195_v20  ;;  %v1434_v39 = vcombine.high %v1430_v22, %v1430_v22  ;;  %v1446_v28 = vunpack.i.h.s16 %v1430_v22  ;;  %v1440_v29 = vunpack.i.h.s16 %v1431_v24  ;;  %v1448_v30 = vunpack.i.h.s16 %v1432_v25  ;;  %v1613_v9 = vld [vmem:[%s3016_s27 + $0xa] sm:$0x1] }
 0x460   : > { %v1442_v31 = vunpack.i.h.s16 %v1433_v27  ;;  %v2663_v33 = vpack.i.b16 %v1423_v21, %v1423_v21  ;;  %v1454_v34 = vpack.i.b16 %v1438_v47, %v1438_v47  ;;  %v2664_v35 = vpack.i.b16 %v1431_v24, %v1431_v24  ;;  %v1616_v2 = vld [vmem:[%s3016_s27 + $0xc] sm:$0x1]  ;;  %v1619_v11 = vld [vmem:[%s3016_s27 + $0xe] sm:$0x1]  ;;  %v1628_v17 = vld [vmem:[%s3016_s27 + $0x14] sm:$0x1] }
 0x461   : > { %v1450_v32 = vunpack.i.h.s16 %v1434_v39  ;;  %v1456_v37 = vpack.i.b16 %v1440_v29, %v1440_v29  ;;  %v2665_v38 = vpack.i.b16 %v1433_v27, %v1433_v27  ;;  %v2666_v43 = vpack.i.b16 %v3181_v50, %v3181_v50  ;;  %v1598_v50 = vld [vmem:[%s3016_s27] sm:$0x1]  ;;  %v1631_v18 = vld [vmem:[%s3016_s27 + $0x16] sm:$0x1]  ;;  %v1634_v20 = vld [vmem:[%s3016_s27 + $0x18] sm:$0x1] }
 0x462   : > { %v1458_v44 = vpack.i.b16 %v1442_v31, %v1442_v31  ;;  %v1460_v45 = vpack.i.b16 %v1444_v26, %v1444_v26  ;;  %v2667_v46 = vpack.i.b16 %v1430_v22, %v1430_v22  ;;  %v1462_v49 = vpack.i.b16 %v1446_v28, %v1446_v28  ;;  %v1637_v19 = vld [vmem:[%s3016_s27 + $0x1a] sm:$0x1]  ;;  %v1640_v26 = vld [vmem:[%s3016_s27 + $0x1c] sm:$0x1]  ;;  %v1643_v27 = vld [vmem:[%s3016_s27 + $0x1e] sm:$0x1] }
 0x463   : > { %v2668_v52 = vpack.i.b16 %v1432_v25, %v1432_v25  ;;  %v1464_v53 = vpack.i.b16 %v1448_v30, %v1448_v30  ;;  %v2669_v54 = vpack.i.b16 %v1434_v39, %v1434_v39  ;;  %v1466_v55 = vpack.i.b16 %v1450_v32, %v1450_v32 }
 0x464   : > { %v1473_v58 = vrot.slane %v2662_v40, %v3155_v36  ;;  %v1480_v59 = vrot.slane %v1452_v48, %v3155_v36  ;;  %v1487_v60 = vrot.slane %v2663_v33, %v3155_v36  ;;  %v1494_v61 = vrot.slane %v1454_v34, %v3155_v36 }
 0x465   : > { %v1501_v3 = vrot.slane %v2664_v35, %v3155_v36  ;;  %v1508_v6 = vrot.slane %v1456_v37, %v3155_v36  ;;  %v1515_v7 = vrot.slane %v2665_v38, %v3155_v36  ;;  %v1522_v8 = vrot.slane %v1458_v44, %v3155_v36 }
 0x466   : > { %v1529_v12 = vrot.slane %v2666_v43, %v3155_v36  ;;  %v1536_v13 = vrot.slane %v1460_v45, %v3155_v36  ;;  %v1543_v15 = vrot.slane %v2667_v46, %v3155_v36  ;;  %v1550_v16 = vrot.slane %v1462_v49, %v3155_v36 }
 0x467   : > { %v1557_v21 = vrot.slane %v2668_v52, %v3155_v36  ;;  %v1564_v22 = vrot.slane %v1464_v53, %v3155_v36  ;;  %v1571_v24 = vrot.slane %v2669_v54, %v3155_v36  ;;  %v1578_v25 = vrot.slane %v1466_v55, %v3155_v36 }
 0x468   : > { %v1599_v39 = vsel %vm3304_vm14, %v1473_v58, %v1598_v50  ;;  %v1602_v47 = vsel %vm3304_vm14, %v1480_v59, %v1601_v56  ;;  %v1605_v28 = vsel %vm3304_vm14, %v1487_v60, %v1604_v57  ;;  %v1608_v29 = vsel %vm3304_vm14, %v1494_v61, %v1607_v62 }
 0x469   : > { %1600 = vst [vmem:[%s3016_s27] sm:$0x1] %v1599_v39  ;;  %1603 = vst [vmem:[%s3016_s27 + $0x2] sm:$0x1] %v1602_v47  ;;  %v1611_v30 = vsel %vm3304_vm14, %v1501_v3, %v1610_v63  ;;  %v1614_v40 = vsel %vm3304_vm14, %v1508_v6, %v1613_v9  ;;  %v1617_v48 = vsel %vm3304_vm14, %v1515_v7, %v1616_v2 }
 0x46a   : > { %1606 = vst [vmem:[%s3016_s27 + $0x4] sm:$0x1] %v1605_v28  ;;  %1609 = vst [vmem:[%s3016_s27 + $0x6] sm:$0x1] %v1608_v29  ;;  %v1620_v31 = vsel %vm3304_vm14, %v1522_v8, %v1619_v11  ;;  %v1623_v32 = vsel %vm3304_vm14, %v1529_v12, %v1622_v0  ;;  %v1626_v33 = vsel %vm3304_vm14, %v1536_v13, %v1625_v1 }
 0x46b   : > { %1612 = vst [vmem:[%s3016_s27 + $0x8] sm:$0x1] %v1611_v30  ;;  %1615 = vst [vmem:[%s3016_s27 + $0xa] sm:$0x1] %v1614_v40  ;;  %v1629_v34 = vsel %vm3304_vm14, %v1543_v15, %v1628_v17  ;;  %v1632_v35 = vsel %vm3304_vm14, %v1550_v16, %v1631_v18  ;;  %v1635_v37 = vsel %vm3304_vm14, %v1557_v21, %v1634_v20 }
 0x46c   : > { %1618 = vst [vmem:[%s3016_s27 + $0xc] sm:$0x1] %v1617_v48  ;;  %1621 = vst [vmem:[%s3016_s27 + $0xe] sm:$0x1] %v1620_v31  ;;  %v1638_v38 = vsel %vm3304_vm14, %v1564_v22, %v1637_v19  ;;  %v1641_v43 = vsel %vm3304_vm14, %v1571_v24, %v1640_v26  ;;  %v1644_v44 = vsel %vm3304_vm14, %v1578_v25, %v1643_v27 }
 0x46d   : > { %1624 = vst [vmem:[%s3016_s27 + $0x10] sm:$0x1] %v1623_v32  ;;  %1627 = vst [vmem:[%s3016_s27 + $0x12] sm:$0x1] %v1626_v33  ;;  %v2670_v45 = vpack.c.bf16 %v3165_v41, %v3165_v41  ;;  %v1660_v46 = vpack.c.bf16 %v3165_v41, %v3167_v42  ;;  %v2210_v49 = vmul.f32 %v3185_v10, %v3147_v4 }
 0x46e   : > { %1630 = vst [vmem:[%s3016_s27 + $0x14] sm:$0x1] %v1629_v34  ;;  %1633 = vst [vmem:[%s3016_s27 + $0x16] sm:$0x1] %v1632_v35  ;;  %v2208_v52 = vmul.f32 %v3187_v14, %v3149_v5 }
 0x46f   : > { %1636 = vst [vmem:[%s3016_s27 + $0x18] sm:$0x1] %v1635_v37  ;;  %1639 = vst [vmem:[%s3016_s27 + $0x1a] sm:$0x1] %v1638_v38  ;;  %v1676_v53 = vrot.slane %v2670_v45, %v3153_v23  ;;  %v1669_v51 = vrot.slane %v1660_v46, %v3153_v23  ;;  %v2688_v54 = vpack.c.bf16 %v2210_v49, %v2210_v49 }
 0x470   : > { %1642 = vst [vmem:[%s3016_s27 + $0x1c] sm:$0x1] %v1641_v43  ;;  %1645 = vst [vmem:[%s3016_s27 + $0x1e] sm:$0x1] %v1644_v44  ;;  %v2211_v55 = vpack.c.bf16 %v2210_v49, %v2208_v52  ;;  %v1873_v49 = vld [vmem:[%s3016_s27] sm:$0x1] }
 0x471   : > { %v1678_v50 = vcombine.high %v1676_v53, %v1676_v53  ;;  %v1692_v56 = vrot.slane %v1676_v53, %v3153_v23  ;;  %v1677_v57 = vcombine.high %v1669_v51, %v1669_v51  ;;  %v3400_v58 = vrot.slane %v1669_v51, %v3153_v23  ;;  %v1876_v52 = vld [vmem:[%s3016_s27 + $0x2] sm:$0x1]  ;;  %v1879_v53 = vld [vmem:[%s3016_s27 + $0x4] sm:$0x1] }
 0x472   : > { %v3403_v4 = vrot.slane %v2688_v54, %v3153_v23  ;;  %v3406_v5 = vrot.slane %v2211_v55, %v3153_v23 }
 0x473   : > { %v1706_v41 = vrot.slane %v1678_v50, %v3153_v23  ;;  %v1708_v42 = vcombine.high %v1692_v56, %v1692_v56  ;;  %v1720_v10 = vunpack.i.h.s16 %v1692_v56  ;;  %v2675_v14 = vpack.i.b16 %v1692_v56, %v1692_v56  ;;  %v1882_v50 = vld [vmem:[%s3016_s27 + $0x6] sm:$0x1]  ;;  %v1885_v56 = vld [vmem:[%s3016_s27 + $0x8] sm:$0x1] }
 0x474   : > { %v3410_v59 = vrot.slane %v1677_v57, %v3153_v23  ;;  %v3414_v60 = vcombine.high %v3400_v58, %v3400_v58  ;;  %v1712_v61 = vunpack.i.h.s16 %v3400_v58  ;;  %v2671_v62 = vpack.i.b16 %v3400_v58, %v3400_v58  ;;  %v1897_v7 = vld [vmem:[%s3016_s27 + $0x10] sm:$0x1]  ;;  %v1900_v17 = vld [vmem:[%s3016_s27 + $0x12] sm:$0x1]  ;;  %v1891_v57 = vld [vmem:[%s3016_s27 + $0xc] sm:$0x1] }
 0x475   : > { %v1710_v0 = vcombine.high %v1706_v41, %v1706_v41  ;;  %v1722_v1 = vunpack.i.h.s16 %v1706_v41  ;;  %v1724_v3 = vunpack.i.h.s16 %v1708_v42  ;;  %v1736_v6 = vpack.i.b16 %v1720_v10, %v1720_v10  ;;  %v1903_v18 = vld [vmem:[%s3016_s27 + $0x14] sm:$0x1]  ;;  %v1906_v19 = vld [vmem:[%s3016_s27 + $0x16] sm:$0x1] }
 0x476   : > { %v2676_v8 = vpack.i.b16 %v1706_v41, %v1706_v41  ;;  %v2677_v9 = vpack.i.b16 %v1708_v42, %v1708_v42  ;;  %v1805_v2 = vrot.slane %v2675_v14, %v3155_v36  ;;  %v1709_v11 = vcombine.high %v3410_v59, %v3410_v59  ;;  %v1909_v20 = vld [vmem:[%s3016_s27 + $0x18] sm:$0x1]  ;;  %v1912_v26 = vld [vmem:[%s3016_s27 + $0x1a] sm:$0x1]  ;;  %v1888_v14 = vld [vmem:[%s3016_s27 + $0xa] sm:$0x1] }
 0x477   : > { %v1726_v12 = vunpack.i.h.s16 %v1710_v0  ;;  %v1738_v13 = vpack.i.b16 %v1722_v1, %v1722_v1  ;;  %v1740_v15 = vpack.i.b16 %v1724_v3, %v1724_v3  ;;  %v2678_v16 = vpack.i.b16 %v1710_v0, %v1710_v0  ;;  %v1915_v27 = vld [vmem:[%s3016_s27 + $0x1c] sm:$0x1]  ;;  %v1918_v31 = vld [vmem:[%s3016_s27 + $0x1e] sm:$0x1] }
 0x478   : > { %v1812_v21 = vrot.slane %v1736_v6, %v3155_v36  ;;  %v1819_v22 = vrot.slane %v2676_v8, %v3155_v36  ;;  %v1833_v24 = vrot.slane %v2677_v9, %v3155_v36  ;;  %v1898_v25 = vsel %vm3420_vm0, %v1805_v2, %v1897_v7 }
 0x479   : > { %v1742_v39 = vpack.i.b16 %v1726_v12, %v1726_v12  ;;  %v1826_v47 = vrot.slane %v1738_v13, %v3155_v36  ;;  %v1840_v28 = vrot.slane %v1740_v15, %v3155_v36  ;;  %v1847_v29 = vrot.slane %v2678_v16, %v3155_v36  ;;  %1899 = vst [vmem:[%s3016_s27 + $0x10] sm:$0x1] %v1898_v25 }
 0x47a   : > { %v1901_v30 = vsel %vm3420_vm0, %v1812_v21, %v1900_v17  ;;  %v1904_v40 = vsel %vm3420_vm0, %v1819_v22, %v1903_v18  ;;  %v1910_v48 = vsel %vm3420_vm0, %v1833_v24, %v1909_v20  ;;  %v1714_v32 = vunpack.i.h.s16 %v3410_v59 }
 0x47b   : > { %v1854_v33 = vrot.slane %v1742_v39, %v3155_v36  ;;  %1902 = vst [vmem:[%s3016_s27 + $0x12] sm:$0x1] %v1901_v30  ;;  %1905 = vst [vmem:[%s3016_s27 + $0x14] sm:$0x1] %v1904_v40  ;;  %v1907_v34 = vsel %vm3420_vm0, %v1826_v47, %v1906_v19  ;;  %v1913_v35 = vsel %vm3420_vm0, %v1840_v28, %v1912_v26  ;;  %v1716_v38 = vunpack.i.h.s16 %v3414_v60  ;;  %v2448_v26 = vld [vmem:[%s3016_s27 + $0x10] sm:$0x2] }
 0x47c   : > { %1911 = vst [vmem:[%s3016_s27 + $0x18] sm:$0x1] %v1910_v48  ;;  %v1916_v37 = vsel %vm3420_vm0, %v1847_v29, %v1915_v27  ;;  %1908 = vst [vmem:[%s3016_s27 + $0x16] sm:$0x1] %v1907_v34  ;;  %v1718_v43 = vunpack.i.h.s16 %v1709_v11  ;;  %v1728_v44 = vpack.i.b16 %v1712_v61, %v1712_v61  ;;  %v2672_v45 = vpack.i.b16 %v3410_v59, %v3410_v59  ;;  %v1894_v59 = vld [vmem:[%s3016_s27 + $0xe] sm:$0x1] }
 0x47d   : > { %1914 = vst [vmem:[%s3016_s27 + $0x1a] sm:$0x1] %v1913_v35  ;;  %1917 = vst [vmem:[%s3016_s27 + $0x1c] sm:$0x1] %v1916_v37  ;;  %v1919_v46 = vsel %vm3420_vm0, %v1854_v33, %v1918_v31  ;;  %v1730_v51 = vpack.i.b16 %v1714_v32, %v1714_v32  ;;  %v2673_v54 = vpack.i.b16 %v3414_v60, %v3414_v60  ;;  %v2451_v48 = vld [vmem:[%s3016_s27 + $0x12] sm:$0x2] }
 0x47e   : > { %v2674_v55 = vpack.i.b16 %v1709_v11, %v1709_v11  ;;  %1920 = vst [vmem:[%s3016_s27 + $0x1e] sm:$0x1] %v1919_v46  ;;  %v1732_v58 = vpack.i.b16 %v1716_v38, %v1716_v38  ;;  %v1734_v41 = vpack.i.b16 %v1718_v43, %v1718_v43  ;;  %v1749_v42 = vrot.slane %v2671_v62, %v3155_v36  ;;  %v2454_v31 = vld [vmem:[%s3016_s27 + $0x14] sm:$0x2]  ;;  %v2460_v32 = vld [vmem:[%s3016_s27 + $0x18] sm:$0x2] }
 0x47f   : > { %v1756_v10 = vrot.slane %v1728_v44, %v3155_v36  ;;  %v1763_v61 = vrot.slane %v2672_v45, %v3155_v36  ;;  %v1770_v60 = vrot.slane %v1730_v51, %v3155_v36  ;;  %v1777_v0 = vrot.slane %v2673_v54, %v3155_v36  ;;  %v2457_v38 = vld [vmem:[%s3016_s27 + $0x16] sm:$0x2]  ;;  %v2463_v43 = vld [vmem:[%s3016_s27 + $0x1a] sm:$0x2]  ;;  %v2466_v44 = vld [vmem:[%s3016_s27 + $0x1c] sm:$0x2] }
 0x480   : > { %v1791_v1 = vrot.slane %v2674_v55, %v3155_v36  ;;  %v1784_v3 = vrot.slane %v1732_v58, %v3155_v36  ;;  %v1798_v62 = vrot.slane %v1734_v41, %v3155_v36  ;;  %v1874_v6 = vsel %vm3420_vm0, %v1749_v42, %v1873_v49 }
 0x481   : > { %v1877_v7 = vsel %vm3420_vm0, %v1756_v10, %v1876_v52  ;;  %1875 = vst [vmem:[%s3016_s27] sm:$0x1] %v1874_v6  ;;  %v1880_v8 = vsel %vm3420_vm0, %v1763_v61, %v1879_v53  ;;  %v1883_v9 = vsel %vm3420_vm0, %v1770_v60, %v1882_v50  ;;  %v1886_v2 = vsel %vm3420_vm0, %v1777_v0, %v1885_v56  ;;  %v2469_v50 = vld [vmem:[%s3016_s27 + $0x1e] sm:$0x2]  ;;  %v2427_v6 = vld [vmem:[%s3016_s27 + $0x2] sm:$0x2] }
 0x482   : > { %1878 = vst [vmem:[%s3016_s27 + $0x2] sm:$0x1] %v1877_v7  ;;  %v1892_v11 = vsel %vm3420_vm0, %v1791_v1, %v1891_v57  ;;  %1881 = vst [vmem:[%s3016_s27 + $0x4] sm:$0x1] %v1880_v8  ;;  %v1889_v12 = vsel %vm3420_vm0, %v1784_v3, %v1888_v14  ;;  %v1895_v13 = vsel %vm3420_vm0, %v1798_v62, %v1894_v59  ;;  %v2424_v62 = vld [vmem:[%s3016_s27] sm:$0x2] }
 0x483   : > { %1884 = vst [vmem:[%s3016_s27 + $0x6] sm:$0x1] %v1883_v9  ;;  %1887 = vst [vmem:[%s3016_s27 + $0x8] sm:$0x1] %v1886_v2  ;;  %v2229_v15 = vcombine.high %v3403_v4, %v3403_v4  ;;  %v2243_v16 = vrot.slane %v3403_v4, %v3153_v23  ;;  %v2228_v17 = vcombine.high %v3406_v5, %v3406_v5  ;;  %v2430_v7 = vld [vmem:[%s3016_s27 + $0x4] sm:$0x2] }
 0x484   : > { %1893 = vst [vmem:[%s3016_s27 + $0xc] sm:$0x1] %v1892_v11  ;;  %1890 = vst [vmem:[%s3016_s27 + $0xa] sm:$0x1] %v1889_v12  ;;  %v3520_v18 = vrot.slane %v3406_v5, %v3153_v23  ;;  %v2433_v11 = vld [vmem:[%s3016_s27 + $0x6] sm:$0x2] }
 0x485   : > { %1896 = vst [vmem:[%s3016_s27 + $0xe] sm:$0x1] %v1895_v13  ;;  %v2257_v63 = vrot.slane %v2229_v15, %v3153_v23  ;;  %v2259_v20 = vcombine.high %v2243_v16, %v2243_v16  ;;  %v2271_v21 = vunpack.i.h.s16 %v2243_v16  ;;  %v2693_v22 = vpack.i.b16 %v2243_v16, %v2243_v16  ;;  %v2436_v12 = vld [vmem:[%s3016_s27 + $0x8] sm:$0x2]  ;;  %v2442_v13 = vld [vmem:[%s3016_s27 + $0xc] sm:$0x2] }
 0x486   : > { %v3524_v24 = vrot.slane %v2228_v17, %v3153_v23  ;;  %v3528_v4 = vcombine.high %v3520_v18, %v3520_v18  ;;  %v2263_v25 = vunpack.i.h.s16 %v3520_v18  ;;  %v2689_v5 = vpack.i.b16 %v3520_v18, %v3520_v18 }
 0x487   : > { %v2261_v27 = vcombine.high %v2257_v63, %v2257_v63  ;;  %v2273_v23 = vunpack.i.h.s16 %v2257_v63  ;;  %v2275_v39 = vunpack.i.h.s16 %v2259_v20  ;;  %v2287_v47 = vpack.i.b16 %v2271_v21, %v2271_v21 }
 0x488   : > { %v2694_v28 = vpack.i.b16 %v2257_v63, %v2257_v63  ;;  %v2695_v29 = vpack.i.b16 %v2259_v20, %v2259_v20  ;;  %v2356_v30 = vrot.slane %v2693_v22, %v3155_v36  ;;  %v2260_v40 = vcombine.high %v3524_v24, %v3524_v24  ;;  %v2439_v63 = vld [vmem:[%s3016_s27 + $0xa] sm:$0x2]  ;;  %v2445_v20 = vld [vmem:[%s3016_s27 + $0xe] sm:$0x2] }
 0x489   : > { %v2277_v33 = vunpack.i.h.s16 %v2261_v27  ;;  %v2289_v34 = vpack.i.b16 %v2273_v23, %v2273_v23  ;;  %v2291_v35 = vpack.i.b16 %v2275_v39, %v2275_v39  ;;  %v2696_v37 = vpack.i.b16 %v2261_v27, %v2261_v27 }
 0x48a   : > { %v2363_v45 = vrot.slane %v2287_v47, %v3155_v36  ;;  %v2370_v46 = vrot.slane %v2694_v28, %v3155_v36  ;;  %v2384_v49 = vrot.slane %v2695_v29, %v3155_v36  ;;  %v2449_v52 = vsel %vm3534_vm2, %v2356_v30, %v2448_v26 }
 0x48b   : > { %v2293_v53 = vpack.i.b16 %v2277_v33, %v2277_v33  ;;  %v2377_v51 = vrot.slane %v2289_v34, %v3155_v36  ;;  %v2391_v54 = vrot.slane %v2291_v35, %v3155_v36  ;;  %v2398_v55 = vrot.slane %v2696_v37, %v3155_v36  ;;  %2450 = vst [vmem:[%s3016_s27 + $0x10] sm:$0x2] %v2449_v52 }
 0x48c   : > { %v2452_v56 = vsel %vm3534_vm2, %v2363_v45, %v2451_v48  ;;  %v2455_v57 = vsel %vm3534_vm2, %v2370_v46, %v2454_v31  ;;  %v2461_v58 = vsel %vm3534_vm2, %v2384_v49, %v2460_v32  ;;  %v2265_v41 = vunpack.i.h.s16 %v3524_v24 }
 0x48d   : > { %v2405_v42 = vrot.slane %v2293_v53, %v3155_v36  ;;  %2453 = vst [vmem:[%s3016_s27 + $0x12] sm:$0x2] %v2452_v56  ;;  %2456 = vst [vmem:[%s3016_s27 + $0x14] sm:$0x2] %v2455_v57  ;;  %v2458_v10 = vsel %vm3534_vm2, %v2377_v51, %v2457_v38  ;;  %v2464_v14 = vsel %vm3534_vm2, %v2391_v54, %v2463_v43  ;;  %v2267_v61 = vunpack.i.h.s16 %v3528_v4 }
 0x48e   : > { %2462 = vst [vmem:[%s3016_s27 + $0x18] sm:$0x2] %v2461_v58  ;;  %v2467_v59 = vsel %vm3534_vm2, %v2398_v55, %v2466_v44  ;;  %2459 = vst [vmem:[%s3016_s27 + $0x16] sm:$0x2] %v2458_v10  ;;  %v2269_v60 = vunpack.i.h.s16 %v2260_v40  ;;  %v2279_v0 = vpack.i.b16 %v2263_v25, %v2263_v25  ;;  %v2690_v1 = vpack.i.b16 %v3524_v24, %v3524_v24 }
 0x48f   : > { %2465 = vst [vmem:[%s3016_s27 + $0x1a] sm:$0x2] %v2464_v14  ;;  %2468 = vst [vmem:[%s3016_s27 + $0x1c] sm:$0x2] %v2467_v59  ;;  %v2470_v3 = vsel %vm3534_vm2, %v2405_v42, %v2469_v50  ;;  %v2281_v8 = vpack.i.b16 %v2265_v41, %v2265_v41  ;;  %v2691_v9 = vpack.i.b16 %v3528_v4, %v3528_v4 }
 0x490   : > { %v2692_v2 = vpack.i.b16 %v2260_v40, %v2260_v40  ;;  %2471 = vst [vmem:[%s3016_s27 + $0x1e] sm:$0x2] %v2470_v3  ;;  %v2283_v15 = vpack.i.b16 %v2267_v61, %v2267_v61  ;;  %v2285_v16 = vpack.i.b16 %v2269_v60, %v2269_v60  ;;  %v2300_v17 = vrot.slane %v2689_v5, %v3155_v36 }
 0x491   : > { %v2307_v18 = vrot.slane %v2279_v0, %v3155_v36  ;;  %v2314_v21 = vrot.slane %v2690_v1, %v3155_v36  ;;  %v2321_v22 = vrot.slane %v2281_v8, %v3155_v36  ;;  %v2328_v24 = vrot.slane %v2691_v9, %v3155_v36 }
 0x492   : > { %v2342_v4 = vrot.slane %v2692_v2, %v3155_v36  ;;  %v2335_v25 = vrot.slane %v2283_v15, %v3155_v36  ;;  %v2349_v5 = vrot.slane %v2285_v16, %v3155_v36  ;;  %v2425_v26 = vsel %vm3534_vm2, %v2300_v17, %v2424_v62 }
 0x493   : > { %v2428_v27 = vsel %vm3534_vm2, %v2307_v18, %v2427_v6  ;;  %2426 = vst [vmem:[%s3016_s27] sm:$0x2] %v2425_v26  ;;  %v2431_v23 = vsel %vm3534_vm2, %v2314_v21, %v2430_v7  ;;  %v2434_v39 = vsel %vm3534_vm2, %v2321_v22, %v2433_v11  ;;  %v2437_v47 = vsel %vm3534_vm2, %v2328_v24, %v2436_v12 }
 0x494   : > { %2429 = vst [vmem:[%s3016_s27 + $0x2] sm:$0x2] %v2428_v27  ;;  %v2443_v36 = vsel %vm3534_vm2, %v2342_v4, %v2442_v13  ;;  %2432 = vst [vmem:[%s3016_s27 + $0x4] sm:$0x2] %v2431_v23  ;;  %v2440_v28 = vsel %vm3534_vm2, %v2335_v25, %v2439_v63  ;;  %v2446_v29 = vsel %vm3534_vm2, %v2349_v5, %v2445_v20 }
 0x495   : > { %2435 = vst [vmem:[%s3016_s27 + $0x6] sm:$0x2] %v2434_v39  ;;  %2438 = vst [vmem:[%s3016_s27 + $0x8] sm:$0x2] %v2437_v47 }
 0x496   : > { %2444 = vst [vmem:[%s3016_s27 + $0xc] sm:$0x2] %v2443_v36  ;;  %2441 = vst [vmem:[%s3016_s27 + $0xa] sm:$0x2] %v2440_v28 }
 0x497   : > { %2447 = vst [vmem:[%s3016_s27 + $0xe] sm:$0x2] %v2446_v29 }
 0x498 PF: > { %s17_s24 = sadd.s32 1, %s2923_s24   ;;  %s3649_s22 = smov %s2919_s23 }
 0x499   : > { %p14_p12 = scmp.ge.s32.totalorder %s17_s24, 4   ;;  %s3650_s23 = smov %s3652_s0 }
 0x49b   :  { %16 = sbr.rel (!%p14_p12) target bundleno = 3 (0x3), region = 84 }

</bundles_post_ra>
